<compile_context>
chip_gen: v6e
topology: v6e:2x2x1
jax: 0.10.0
libtpu: 0.0.40
codegen_flags: <defaults>
</compile_context>

<pallas_src>
import functools

import numpy as np
import jax
import jax.numpy as jnp
from jax.experimental import pallas as pl
from jax.experimental.pallas import tpu as pltpu


# ----------------------------------------------------------------------------
# Pallas kernel
# ----------------------------------------------------------------------------
def _bucket_decode_kernel(cls_ref, off_ref, prop_ref, out_ref, *,
                          num_buckets, side_num, scale_factor, max_shape):
    S = side_num

    # Natural-layout blocks (proposals on sublanes, 4*S features on lanes).
    # Transpose in-kernel (XLU; pltpu.einshape would be equivalent) to the
    # dense feature-major layout used for the per-side reductions.
    cls = cls_ref[...].astype(jnp.float32).T     # (4*S, TN)
    off = off_ref[...].astype(jnp.float32).T     # (4*S, TN)
    prop = prop_ref[...].astype(jnp.float32)     # (4, TN)  (tiny, pre-transposed)
    TN = cls.shape[-1]

    # --- bbox_rescale_batched (around the box center); consts folded ---------
    px1 = prop[0:1, :]
    py1 = prop[1:2, :]
    px2 = prop[2:3, :]
    py2 = prop[3:4, :]
    cx = (px1 + px2) * 0.5
    cy = (py1 + py2) * 0.5
    w = px2 - px1
    h = py2 - py1
    half_sf = 0.5 * float(scale_factor)
    inv_nb = float(scale_factor) / float(num_buckets)   # multiply, not divide
    rx1 = cx - w * half_sf
    rx2 = cx + w * half_sf
    ry1 = cy - h * half_sf
    ry2 = cy + h * half_sf
    bucket_w = w * inv_nb
    bucket_h = h * inv_nb

    iota = jax.lax.broadcasted_iota(jnp.int32, (S, TN), 0)

    # 4 sides ordered (left->x1, right->x2, top->y1, down->y2), matching the
    # reference's ::2 / 1::2 split of the flattened (4, S) feature layout.
    idx1, goff = [], []
    conf = jnp.zeros((1, TN), jnp.float32)
    for side in range(4):
        logits = cls[side * S:(side + 1) * S, :]          # (S, TN)
        off_s = off[side * S:(side + 1) * S, :]           # (S, TN)

        # top-1 / top-2 on raw logits (argmax is softmax-invariant)
        m = jnp.max(logits, axis=0, keepdims=True)                       # (1,TN)
        i1 = jnp.min(jnp.where(logits == m, iota, S), axis=0, keepdims=True)
        is_top1 = iota == i1
        masked = jnp.where(is_top1, jnp.float32(-1e30), logits)
        m2 = jnp.max(masked, axis=0, keepdims=True)
        i2 = jnp.min(jnp.where(masked == m2, iota, S), axis=0, keepdims=True)

        # softmax values only where needed: top1 prob == 1/denom,
        # top2 prob == exp(m2 - m)/denom.  Exact reciprocal (see header note).
        denom = jnp.sum(jnp.exp(logits - m), axis=0, keepdims=True)
        rdenom = 1.0 / denom
        v2num = jnp.exp(m2 - m)

        # gather offset at the argmax bucket
        g = jnp.sum(jnp.where(is_top1, off_s, 0.0), axis=0, keepdims=True)

        nb_ind = jnp.abs((i1 - i2).astype(jnp.float32)) - 1.0
        conf = conf + rdenom * (1.0 + v2num * nb_ind)

        idx1.append(i1.astype(jnp.float32))
        goff.append(g)

    iL, iR, iT, iD = idx1
    gL, gR, gT, gD = goff

    x1 = rx1 + (0.5 + iL - gL) * bucket_w
    x2 = rx2 - (0.5 + iR + gR) * bucket_w
    y1 = ry1 + (0.5 + iT - gT) * bucket_h
    y2 = ry2 - (0.5 + iD + gD) * bucket_h

    if max_shape is not None:
        x1 = jnp.clip(x1, 0.0, max_shape[1] - 1)
        x2 = jnp.clip(x2, 0.0, max_shape[1] - 1)
        y1 = jnp.clip(y1, 0.0, max_shape[0] - 1)
        y2 = jnp.clip(y2, 0.0, max_shape[0] - 1)

    conf = conf * 0.25
    pad = jnp.zeros((3, TN), jnp.float32)
    # single aligned (8, TN) store: x1,y1,x2,y2,conf,pad,pad,pad
    out_ref[...] = jnp.concatenate([x1, y1, x2, y2, conf, pad], axis=0)


# ----------------------------------------------------------------------------
# Wrapper (glue: free reshapes + pallas_call + small output split)
# ----------------------------------------------------------------------------
def _pick_tile(total, max_tile=2048, target_min_grid=2):
    """Largest 128-multiple divisor of `total` <= max_tile, preferring a grid
    with at least `target_min_grid` points (megacore / v7x dual-TC balance)."""
    divs = [d for d in range(128, min(max_tile, total) + 1, 128)
            if total % d == 0]
    pref = [d for d in divs if total // d >= target_min_grid]
    return max(pref) if pref else max(divs)


def bucket2bbox_pallas(proposals, cls_preds, offset_preds, *,
                       num_buckets, scale_factor=1.0, max_shape=None,
                       max_tile=2048):
    """proposals: (B, N, 4); cls_preds / offset_preds: (B, N, 4*side_num)."""
    B, N, _ = proposals.shape
    S = int(np.ceil(num_buckets / 2.0))
    BN = B * N
    assert cls_preds.shape == (B, N, 4 * S)
    assert offset_preds.shape == (B, N, 4 * S)
    assert BN % 128 == 0, "batch_size * num_proposals must be a multiple of 128"

    tn = _pick_tile(BN, max_tile=max_tile)

    # Free reshapes: natural layout for the large tensors (no XLA transpose).
    cls2 = cls_preds.reshape(BN, 4 * S)
    off2 = offset_preds.reshape(BN, 4 * S)
    # Only the tiny proposals tensor is transposed in the wrapper.
    propT = proposals.reshape(BN, 4).T                     # (4, BN)

    kernel = functools.partial(
        _bucket_decode_kernel,
        num_buckets=num_buckets, side_num=S,
        scale_factor=scale_factor, max_shape=max_shape)

    out = pl.pallas_call(
        kernel,
        out_shape=jax.ShapeDtypeStruct((8, BN), jnp.float32),
        grid=(BN // tn,),
        in_specs=[
            pl.BlockSpec((tn, 4 * S), lambda i: (i, 0)),   # cls, natural layout
            pl.BlockSpec((tn, 4 * S), lambda i: (i, 0)),   # offsets, natural
            pl.BlockSpec((4, tn), lambda i: (0, i)),       # proposals^T
        ],
        out_specs=pl.BlockSpec((8, tn), lambda i: (0, i)), # merged output
        compiler_params=pltpu.CompilerParams(
            dimension_semantics=("parallel",)),
    )(cls2, off2, propT)

    bboxes = out[:4, :].T.reshape(B, N, 4)
    loc_confidence = out[4, :].reshape(B, N)
    return bboxes, loc_confidence


class BucketingBBoxCoderWraper:
    """Mirror of the PyTorch wrapper; no learnable parameters."""

    def __init__(self, num_buckets=8, scale_factor=1.5):
        self.num_buckets = num_buckets
        self.scale_factor = scale_factor

    def forward(self, *args, **kwargs):
        pass  # TODO(synk): original forward() is an empty stub in mmdet2trt

    def decode(self, bboxes, pred_bboxes, max_shape=None):
        cls_preds, offset_preds = pred_bboxes
        return bucket2bbox_pallas(
            bboxes, cls_preds, offset_preds,
            num_buckets=self.num_buckets,
            scale_factor=self.scale_factor,
            max_shape=max_shape)


# ----------------------------------------------------------------------------
# Pure-JAX reference (mirrors the torch code) for verification
# ----------------------------------------------------------------------------
def bucket2bbox_ref(proposals, cls_preds, offset_preds, num_buckets,
                    scale_factor=1.0, max_shape=None):
    B = cls_preds.shape[0]
    S = int(np.ceil(num_buckets / 2.0))
    cls = cls_preds.reshape(B, -1, S)
    offp = offset_preds.reshape(B, -1, S)
    scores = jax.nn.softmax(cls, axis=2)
    order = jnp.argsort(-scores, axis=2)
    label0 = order[..., 0]
    label1 = order[..., 1]
    top0 = jnp.take_along_axis(scores, label0[..., None], axis=2)[..., 0]
    top1 = jnp.take_along_axis(scores, label1[..., None], axis=2)[..., 0]

    cx = (proposals[..., 0] + proposals[..., 2]) * 0.5
    cy = (proposals[..., 1] + proposals[..., 3]) * 0.5
    w = (proposals[..., 2] - proposals[..., 0]) * scale_factor
    h = (proposals[..., 3] - proposals[..., 1]) * scale_factor
    pxy1 = jnp.stack([cx - 0.5 * w, cy - 0.5 * h], axis=-1)
    pxy2 = jnp.stack([cx + 0.5 * w, cy + 0.5 * h], axis=-1)
    bucket_wh = (pxy2 - pxy1) / num_buckets

    label0_r = label0.reshape(B, -1, 4)
    lt = label0_r[:, :, ::2]
    rd = label0_r[:, :, 1::2]
    lt_buckets = pxy1 + (0.5 + lt.astype(jnp.float32)) * bucket_wh
    rd_buckets = pxy2 - (0.5 + rd.astype(jnp.float32)) * bucket_wh

    offsets = offp.reshape(B, -1, 4, S)
    lt_off = jnp.take_along_axis(offsets[:, :, ::2, :], lt[..., None], axis=3)[..., 0]
    rd_off = jnp.take_along_axis(offsets[:, :, 1::2, :], rd[..., None], axis=3)[..., 0]

    xy1 = lt_buckets - lt_off * bucket_wh
    xy2 = rd_buckets - rd_off * bucket_wh
    x1, y1 = xy1[..., 0], xy1[..., 1]
    x2, y2 = xy2[..., 0], xy2[..., 1]
    if max_shape is not None:
        x1 = jnp.clip(x1, 0, max_shape[1] - 1)
        y1 = jnp.clip(y1, 0, max_shape[0] - 1)
        x2 = jnp.clip(x2, 0, max_shape[1] - 1)
        y2 = jnp.clip(y2, 0, max_shape[0] - 1)
    bboxes = jnp.stack([x1, y1, x2, y2], axis=-1)

    conf = top0 + top1 * (jnp.abs((label0 - label1).astype(jnp.float32)) - 1.0)
    conf = conf.reshape(B, -1, 4).mean(axis=2)
    return bboxes, conf


# ----------------------------------------------------------------------------
if __name__ == "__main__":
    B, N = 2, 256
    NUM_BUCKETS = 8
    SIDE_NUM = int(np.ceil(NUM_BUCKETS / 2.0))   # 4
    SCALE_FACTOR = 1.5
    MAX_SHAPE = (64, 80)                          # (H, W)

    key = jax.random.PRNGKey(0)
    k1, k2, k3, k4, k5 = jax.random.split(key, 5)

    # deterministic proposals with positive width/height
    x1 = jax.random.uniform(k1, (B, N), minval=0.0, maxval=40.0)
    y1 = jax.random.uniform(k2, (B, N), minval=0.0, maxval=30.0)
    wh = jax.random.uniform(k3, (B, N, 2), minval=4.0, maxval=30.0)
    proposals = jnp.stack([x1, y1, x1 + wh[..., 0], y1 + wh[..., 1]],
                          axis=-1).astype(jnp.float32)

    cls_preds = jax.random.normal(k4, (B, N, 4 * SIDE_NUM), dtype=jnp.float32)
    offset_preds = 0.5 * jax.random.normal(k5, (B, N, 4 * SIDE_NUM),
                                           dtype=jnp.float32)

    coder = BucketingBBoxCoderWraper(num_buckets=NUM_BUCKETS,
                                     scale_factor=SCALE_FACTOR)
    bboxes, conf = coder.decode(proposals, (cls_preds, offset_preds),
                                max_shape=MAX_SHAPE)
    jax.block_until_ready((bboxes, conf))

    bboxes_ref, conf_ref = bucket2bbox_ref(
        proposals, cls_preds, offset_preds, NUM_BUCKETS,
        scale_factor=SCALE_FACTOR, max_shape=MAX_SHAPE)

    assert bboxes.shape == (B, N, 4) and conf.shape == (B, N)
    np.testing.assert_allclose(np.asarray(bboxes), np.asarray(bboxes_ref),
                               rtol=1e-4, atol=1e-4)
    np.testing.assert_allclose(np.asarray(conf), np.asarray(conf_ref),
                               rtol=1e-4, atol=1e-4)
    print("KERNEL_OK")
</pallas_src>

<mosaic_0001>
module attributes {stable_mosaic.version = 11 : i64} {
  func.func @_bucket_decode_kernel(%arg0: i32, %arg1: memref<256x16xf32, #tpu.memory_space<vmem>>, %arg2: memref<256x16xf32, #tpu.memory_space<vmem>>, %arg3: memref<4x256xf32, #tpu.memory_space<vmem>>, %arg4: memref<8x256xf32, #tpu.memory_space<vmem>>) attributes {dimension_semantics = [#tpu.dimension_semantics<parallel>], iteration_bounds = array<i64: 2>, scalar_prefetch = 0 : i64, scratch_operands = 0 : i64, tpu.core_type = #tpu.core_type<tc>, window_params = [{transform_indices = @transform_0, window_bounds = array<i64: 256, 16>}, {transform_indices = @transform_1, window_bounds = array<i64: 256, 16>}, {transform_indices = @transform_2, window_bounds = array<i64: 4, 256>}, {transform_indices = @transform_3, window_bounds = array<i64: 8, 256>}]} {
    %c0 = arith.constant 0 : index
    %c0_0 = arith.constant 0 : index
    %0 = vector.load %arg1[%c0, %c0_0] : memref<256x16xf32, #tpu.memory_space<vmem>>, vector<256x16xf32>
    %1 = tpu.transpose %0, [1, 0] : vector<256x16xf32> -> vector<16x256xf32>
    %c0_1 = arith.constant 0 : index
    %c0_2 = arith.constant 0 : index
    %2 = vector.load %arg2[%c0_1, %c0_2] : memref<256x16xf32, #tpu.memory_space<vmem>>, vector<256x16xf32>
    %3 = tpu.transpose %2, [1, 0] : vector<256x16xf32> -> vector<16x256xf32>
    %c0_3 = arith.constant 0 : index
    %c0_4 = arith.constant 0 : index
    %4 = vector.load %arg3[%c0_3, %c0_4] : memref<4x256xf32, #tpu.memory_space<vmem>>, vector<4x256xf32>
    %5 = vector.extract_strided_slice %4 {offsets = [0, 0], sizes = [1, 256], strides = [1, 1]} : vector<4x256xf32> to vector<1x256xf32>
    %6 = vector.extract_strided_slice %4 {offsets = [1, 0], sizes = [1, 256], strides = [1, 1]} : vector<4x256xf32> to vector<1x256xf32>
    %7 = vector.extract_strided_slice %4 {offsets = [2, 0], sizes = [1, 256], strides = [1, 1]} : vector<4x256xf32> to vector<1x256xf32>
    %8 = vector.extract_strided_slice %4 {offsets = [3, 0], sizes = [1, 256], strides = [1, 1]} : vector<4x256xf32> to vector<1x256xf32>
    %9 = arith.addf %5, %7 : vector<1x256xf32>
    %cst = arith.constant 5.000000e-01 : f32
    %10 = vector.broadcast %cst : f32 to vector<1x256xf32>
    %11 = arith.mulf %9, %10 : vector<1x256xf32>
    %12 = arith.addf %6, %8 : vector<1x256xf32>
    %cst_5 = arith.constant 5.000000e-01 : f32
    %13 = vector.broadcast %cst_5 : f32 to vector<1x256xf32>
    %14 = arith.mulf %12, %13 : vector<1x256xf32>
    %15 = arith.subf %7, %5 : vector<1x256xf32>
    %16 = arith.subf %8, %6 : vector<1x256xf32>
    %cst_6 = arith.constant 7.500000e-01 : f32
    %17 = vector.broadcast %cst_6 : f32 to vector<1x256xf32>
    %18 = arith.mulf %15, %17 : vector<1x256xf32>
    %19 = arith.subf %11, %18 : vector<1x256xf32>
    %cst_7 = arith.constant 7.500000e-01 : f32
    %20 = vector.broadcast %cst_7 : f32 to vector<1x256xf32>
    %21 = arith.mulf %15, %20 : vector<1x256xf32>
    %22 = arith.addf %11, %21 : vector<1x256xf32>
    %cst_8 = arith.constant 7.500000e-01 : f32
    %23 = vector.broadcast %cst_8 : f32 to vector<1x256xf32>
    %24 = arith.mulf %16, %23 : vector<1x256xf32>
    %25 = arith.subf %14, %24 : vector<1x256xf32>
    %cst_9 = arith.constant 7.500000e-01 : f32
    %26 = vector.broadcast %cst_9 : f32 to vector<1x256xf32>
    %27 = arith.mulf %16, %26 : vector<1x256xf32>
    %28 = arith.addf %14, %27 : vector<1x256xf32>
    %cst_10 = arith.constant 1.875000e-01 : f32
    %29 = vector.broadcast %cst_10 : f32 to vector<1x256xf32>
    %30 = arith.mulf %15, %29 : vector<1x256xf32>
    %cst_11 = arith.constant 1.875000e-01 : f32
    %31 = vector.broadcast %cst_11 : f32 to vector<1x256xf32>
    %32 = arith.mulf %16, %31 : vector<1x256xf32>
    %33 = tpu.iota {dimensions = array<i32: 0>} : vector<4x256xi32>
    %cst_12 = arith.constant 0.000000e+00 : f32
    %34 = vector.broadcast %cst_12 : f32 to vector<1x256xf32>
    %35 = vector.extract_strided_slice %1 {offsets = [0, 0], sizes = [4, 256], strides = [1, 1]} : vector<16x256xf32> to vector<4x256xf32>
    %36 = vector.extract_strided_slice %3 {offsets = [0, 0], sizes = [4, 256], strides = [1, 1]} : vector<16x256xf32> to vector<4x256xf32>
    %cst_13 = arith.constant dense<0xFF800000> : vector<256xf32>
    %37 = vector.multi_reduction <maximumf>, %35, %cst_13 [0] : vector<4x256xf32> to vector<256xf32>
    %38 = vector.shape_cast %37 : vector<256xf32> to vector<1x256xf32>
    %39 = vector.broadcast %38 : vector<1x256xf32> to vector<4x256xf32>
    %40 = arith.cmpf oeq, %35, %39 : vector<4x256xf32>
    %c4_i32 = arith.constant 4 : i32
    %41 = vector.broadcast %c4_i32 : i32 to vector<4x256xi32>
    %42 = arith.select %40, %33, %41 : vector<4x256xi1>, vector<4x256xi32>
    %cst_14 = arith.constant dense<2147483647> : vector<256xi32>
    %43 = vector.multi_reduction <minsi>, %42, %cst_14 [0] : vector<4x256xi32> to vector<256xi32>
    %44 = vector.shape_cast %43 : vector<256xi32> to vector<1x256xi32>
    %45 = vector.broadcast %44 : vector<1x256xi32> to vector<4x256xi32>
    %46 = arith.cmpi eq, %33, %45 : vector<4x256xi32>
    %cst_15 = arith.constant -1.000000e+30 : f32
    %47 = vector.broadcast %cst_15 : f32 to vector<4x256xf32>
    %48 = arith.select %46, %47, %35 : vector<4x256xi1>, vector<4x256xf32>
    %cst_16 = arith.constant dense<0xFF800000> : vector<256xf32>
    %49 = vector.multi_reduction <maximumf>, %48, %cst_16 [0] : vector<4x256xf32> to vector<256xf32>
    %50 = vector.shape_cast %49 : vector<256xf32> to vector<1x256xf32>
    %51 = vector.broadcast %50 : vector<1x256xf32> to vector<4x256xf32>
    %52 = arith.cmpf oeq, %48, %51 : vector<4x256xf32>
    %c4_i32_17 = arith.constant 4 : i32
    %53 = vector.broadcast %c4_i32_17 : i32 to vector<4x256xi32>
    %54 = arith.select %52, %33, %53 : vector<4x256xi1>, vector<4x256xi32>
    %cst_18 = arith.constant dense<2147483647> : vector<256xi32>
    %55 = vector.multi_reduction <minsi>, %54, %cst_18 [0] : vector<4x256xi32> to vector<256xi32>
    %56 = vector.shape_cast %55 : vector<256xi32> to vector<1x256xi32>
    %57 = vector.broadcast %38 : vector<1x256xf32> to vector<4x256xf32>
    %58 = arith.subf %35, %57 : vector<4x256xf32>
    %59 = math.exp %58 : vector<4x256xf32>
    %cst_19 = arith.constant dense<0.000000e+00> : vector<256xf32>
    %60 = vector.multi_reduction <add>, %59, %cst_19 [0] : vector<4x256xf32> to vector<256xf32>
    %61 = vector.shape_cast %60 : vector<256xf32> to vector<1x256xf32>
    %cst_20 = arith.constant 1.000000e+00 : f32
    %62 = vector.broadcast %cst_20 : f32 to vector<1x256xf32>
    %63 = arith.divf %62, %61 : vector<1x256xf32>
    %64 = arith.subf %50, %38 : vector<1x256xf32>
    %65 = math.exp %64 : vector<1x256xf32>
    %cst_21 = arith.constant 0.000000e+00 : f32
    %66 = vector.broadcast %cst_21 : f32 to vector<4x256xf32>
    %67 = arith.select %46, %36, %66 : vector<4x256xi1>, vector<4x256xf32>
    %cst_22 = arith.constant dense<0.000000e+00> : vector<256xf32>
    %68 = vector.multi_reduction <add>, %67, %cst_22 [0] : vector<4x256xf32> to vector<256xf32>
    %69 = vector.shape_cast %68 : vector<256xf32> to vector<1x256xf32>
    %70 = arith.subi %44, %56 : vector<1x256xi32>
    %71 = arith.sitofp %70 : vector<1x256xi32> to vector<1x256xf32>
    %72 = math.absf %71 : vector<1x256xf32>
    %cst_23 = arith.constant 1.000000e+00 : f32
    %73 = vector.broadcast %cst_23 : f32 to vector<1x256xf32>
    %74 = arith.subf %72, %73 : vector<1x256xf32>
    %75 = arith.mulf %65, %74 : vector<1x256xf32>
    %cst_24 = arith.constant 1.000000e+00 : f32
    %76 = vector.broadcast %cst_24 : f32 to vector<1x256xf32>
    %77 = arith.addf %76, %75 : vector<1x256xf32>
    %78 = arith.mulf %63, %77 : vector<1x256xf32>
    %79 = arith.addf %34, %78 : vector<1x256xf32>
    %80 = arith.sitofp %44 : vector<1x256xi32> to vector<1x256xf32>
    %81 = vector.extract_strided_slice %1 {offsets = [4, 0], sizes = [4, 256], strides = [1, 1]} : vector<16x256xf32> to vector<4x256xf32>
    %82 = vector.extract_strided_slice %3 {offsets = [4, 0], sizes = [4, 256], strides = [1, 1]} : vector<16x256xf32> to vector<4x256xf32>
    %cst_25 = arith.constant dense<0xFF800000> : vector<256xf32>
    %83 = vector.multi_reduction <maximumf>, %81, %cst_25 [0] : vector<4x256xf32> to vector<256xf32>
    %84 = vector.shape_cast %83 : vector<256xf32> to vector<1x256xf32>
    %85 = vector.broadcast %84 : vector<1x256xf32> to vector<4x256xf32>
    %86 = arith.cmpf oeq, %81, %85 : vector<4x256xf32>
    %c4_i32_26 = arith.constant 4 : i32
    %87 = vector.broadcast %c4_i32_26 : i32 to vector<4x256xi32>
    %88 = arith.select %86, %33, %87 : vector<4x256xi1>, vector<4x256xi32>
    %cst_27 = arith.constant dense<2147483647> : vector<256xi32>
    %89 = vector.multi_reduction <minsi>, %88, %cst_27 [0] : vector<4x256xi32> to vector<256xi32>
    %90 = vector.shape_cast %89 : vector<256xi32> to vector<1x256xi32>
    %91 = vector.broadcast %90 : vector<1x256xi32> to vector<4x256xi32>
    %92 = arith.cmpi eq, %33, %91 : vector<4x256xi32>
    %cst_28 = arith.constant -1.000000e+30 : f32
    %93 = vector.broadcast %cst_28 : f32 to vector<4x256xf32>
    %94 = arith.select %92, %93, %81 : vector<4x256xi1>, vector<4x256xf32>
    %cst_29 = arith.constant dense<0xFF800000> : vector<256xf32>
    %95 = vector.multi_reduction <maximumf>, %94, %cst_29 [0] : vector<4x256xf32> to vector<256xf32>
    %96 = vector.shape_cast %95 : vector<256xf32> to vector<1x256xf32>
    %97 = vector.broadcast %96 : vector<1x256xf32> to vector<4x256xf32>
    %98 = arith.cmpf oeq, %94, %97 : vector<4x256xf32>
    %c4_i32_30 = arith.constant 4 : i32
    %99 = vector.broadcast %c4_i32_30 : i32 to vector<4x256xi32>
    %100 = arith.select %98, %33, %99 : vector<4x256xi1>, vector<4x256xi32>
    %cst_31 = arith.constant dense<2147483647> : vector<256xi32>
    %101 = vector.multi_reduction <minsi>, %100, %cst_31 [0] : vector<4x256xi32> to vector<256xi32>
    %102 = vector.shape_cast %101 : vector<256xi32> to vector<1x256xi32>
    %103 = vector.broadcast %84 : vector<1x256xf32> to vector<4x256xf32>
    %104 = arith.subf %81, %103 : vector<4x256xf32>
    %105 = math.exp %104 : vector<4x256xf32>
    %cst_32 = arith.constant dense<0.000000e+00> : vector<256xf32>
    %106 = vector.multi_reduction <add>, %105, %cst_32 [0] : vector<4x256xf32> to vector<256xf32>
    %107 = vector.shape_cast %106 : vector<256xf32> to vector<1x256xf32>
    %cst_33 = arith.constant 1.000000e+00 : f32
    %108 = vector.broadcast %cst_33 : f32 to vector<1x256xf32>
    %109 = arith.divf %108, %107 : vector<1x256xf32>
    %110 = arith.subf %96, %84 : vector<1x256xf32>
    %111 = math.exp %110 : vector<1x256xf32>
    %cst_34 = arith.constant 0.000000e+00 : f32
    %112 = vector.broadcast %cst_34 : f32 to vector<4x256xf32>
    %113 = arith.select %92, %82, %112 : vector<4x256xi1>, vector<4x256xf32>
    %cst_35 = arith.constant dense<0.000000e+00> : vector<256xf32>
    %114 = vector.multi_reduction <add>, %113, %cst_35 [0] : vector<4x256xf32> to vector<256xf32>
    %115 = vector.shape_cast %114 : vector<256xf32> to vector<1x256xf32>
    %116 = arith.subi %90, %102 : vector<1x256xi32>
    %117 = arith.sitofp %116 : vector<1x256xi32> to vector<1x256xf32>
    %118 = math.absf %117 : vector<1x256xf32>
    %cst_36 = arith.constant 1.000000e+00 : f32
    %119 = vector.broadcast %cst_36 : f32 to vector<1x256xf32>
    %120 = arith.subf %118, %119 : vector<1x256xf32>
    %121 = arith.mulf %111, %120 : vector<1x256xf32>
    %cst_37 = arith.constant 1.000000e+00 : f32
    %122 = vector.broadcast %cst_37 : f32 to vector<1x256xf32>
    %123 = arith.addf %122, %121 : vector<1x256xf32>
    %124 = arith.mulf %109, %123 : vector<1x256xf32>
    %125 = arith.addf %79, %124 : vector<1x256xf32>
    %126 = arith.sitofp %90 : vector<1x256xi32> to vector<1x256xf32>
    %127 = vector.extract_strided_slice %1 {offsets = [8, 0], sizes = [4, 256], strides = [1, 1]} : vector<16x256xf32> to vector<4x256xf32>
    %128 = vector.extract_strided_slice %3 {offsets = [8, 0], sizes = [4, 256], strides = [1, 1]} : vector<16x256xf32> to vector<4x256xf32>
    %cst_38 = arith.constant dense<0xFF800000> : vector<256xf32>
    %129 = vector.multi_reduction <maximumf>, %127, %cst_38 [0] : vector<4x256xf32> to vector<256xf32>
    %130 = vector.shape_cast %129 : vector<256xf32> to vector<1x256xf32>
    %131 = vector.broadcast %130 : vector<1x256xf32> to vector<4x256xf32>
    %132 = arith.cmpf oeq, %127, %131 : vector<4x256xf32>
    %c4_i32_39 = arith.constant 4 : i32
    %133 = vector.broadcast %c4_i32_39 : i32 to vector<4x256xi32>
    %134 = arith.select %132, %33, %133 : vector<4x256xi1>, vector<4x256xi32>
    %cst_40 = arith.constant dense<2147483647> : vector<256xi32>
    %135 = vector.multi_reduction <minsi>, %134, %cst_40 [0] : vector<4x256xi32> to vector<256xi32>
    %136 = vector.shape_cast %135 : vector<256xi32> to vector<1x256xi32>
    %137 = vector.broadcast %136 : vector<1x256xi32> to vector<4x256xi32>
    %138 = arith.cmpi eq, %33, %137 : vector<4x256xi32>
    %cst_41 = arith.constant -1.000000e+30 : f32
    %139 = vector.broadcast %cst_41 : f32 to vector<4x256xf32>
    %140 = arith.select %138, %139, %127 : vector<4x256xi1>, vector<4x256xf32>
    %cst_42 = arith.constant dense<0xFF800000> : vector<256xf32>
    %141 = vector.multi_reduction <maximumf>, %140, %cst_42 [0] : vector<4x256xf32> to vector<256xf32>
    %142 = vector.shape_cast %141 : vector<256xf32> to vector<1x256xf32>
    %143 = vector.broadcast %142 : vector<1x256xf32> to vector<4x256xf32>
    %144 = arith.cmpf oeq, %140, %143 : vector<4x256xf32>
    %c4_i32_43 = arith.constant 4 : i32
    %145 = vector.broadcast %c4_i32_43 : i32 to vector<4x256xi32>
    %146 = arith.select %144, %33, %145 : vector<4x256xi1>, vector<4x256xi32>
    %cst_44 = arith.constant dense<2147483647> : vector<256xi32>
    %147 = vector.multi_reduction <minsi>, %146, %cst_44 [0] : vector<4x256xi32> to vector<256xi32>
    %148 = vector.shape_cast %147 : vector<256xi32> to vector<1x256xi32>
    %149 = vector.broadcast %130 : vector<1x256xf32> to vector<4x256xf32>
    %150 = arith.subf %127, %149 : vector<4x256xf32>
    %151 = math.exp %150 : vector<4x256xf32>
    %cst_45 = arith.constant dense<0.000000e+00> : vector<256xf32>
    %152 = vector.multi_reduction <add>, %151, %cst_45 [0] : vector<4x256xf32> to vector<256xf32>
    %153 = vector.shape_cast %152 : vector<256xf32> to vector<1x256xf32>
    %cst_46 = arith.constant 1.000000e+00 : f32
    %154 = vector.broadcast %cst_46 : f32 to vector<1x256xf32>
    %155 = arith.divf %154, %153 : vector<1x256xf32>
    %156 = arith.subf %142, %130 : vector<1x256xf32>
    %157 = math.exp %156 : vector<1x256xf32>
    %cst_47 = arith.constant 0.000000e+00 : f32
    %158 = vector.broadcast %cst_47 : f32 to vector<4x256xf32>
    %159 = arith.select %138, %128, %158 : vector<4x256xi1>, vector<4x256xf32>
    %cst_48 = arith.constant dense<0.000000e+00> : vector<256xf32>
    %160 = vector.multi_reduction <add>, %159, %cst_48 [0] : vector<4x256xf32> to vector<256xf32>
    %161 = vector.shape_cast %160 : vector<256xf32> to vector<1x256xf32>
    %162 = arith.subi %136, %148 : vector<1x256xi32>
    %163 = arith.sitofp %162 : vector<1x256xi32> to vector<1x256xf32>
    %164 = math.absf %163 : vector<1x256xf32>
    %cst_49 = arith.constant 1.000000e+00 : f32
    %165 = vector.broadcast %cst_49 : f32 to vector<1x256xf32>
    %166 = arith.subf %164, %165 : vector<1x256xf32>
    %167 = arith.mulf %157, %166 : vector<1x256xf32>
    %cst_50 = arith.constant 1.000000e+00 : f32
    %168 = vector.broadcast %cst_50 : f32 to vector<1x256xf32>
    %169 = arith.addf %168, %167 : vector<1x256xf32>
    %170 = arith.mulf %155, %169 : vector<1x256xf32>
    %171 = arith.addf %125, %170 : vector<1x256xf32>
    %172 = arith.sitofp %136 : vector<1x256xi32> to vector<1x256xf32>
    %173 = vector.extract_strided_slice %1 {offsets = [12, 0], sizes = [4, 256], strides = [1, 1]} : vector<16x256xf32> to vector<4x256xf32>
    %174 = vector.extract_strided_slice %3 {offsets = [12, 0], sizes = [4, 256], strides = [1, 1]} : vector<16x256xf32> to vector<4x256xf32>
    %cst_51 = arith.constant dense<0xFF800000> : vector<256xf32>
    %175 = vector.multi_reduction <maximumf>, %173, %cst_51 [0] : vector<4x256xf32> to vector<256xf32>
    %176 = vector.shape_cast %175 : vector<256xf32> to vector<1x256xf32>
    %177 = vector.broadcast %176 : vector<1x256xf32> to vector<4x256xf32>
    %178 = arith.cmpf oeq, %173, %177 : vector<4x256xf32>
    %c4_i32_52 = arith.constant 4 : i32
    %179 = vector.broadcast %c4_i32_52 : i32 to vector<4x256xi32>
    %180 = arith.select %178, %33, %179 : vector<4x256xi1>, vector<4x256xi32>
    %cst_53 = arith.constant dense<2147483647> : vector<256xi32>
    %181 = vector.multi_reduction <minsi>, %180, %cst_53 [0] : vector<4x256xi32> to vector<256xi32>
    %182 = vector.shape_cast %181 : vector<256xi32> to vector<1x256xi32>
    %183 = vector.broadcast %182 : vector<1x256xi32> to vector<4x256xi32>
    %184 = arith.cmpi eq, %33, %183 : vector<4x256xi32>
    %cst_54 = arith.constant -1.000000e+30 : f32
    %185 = vector.broadcast %cst_54 : f32 to vector<4x256xf32>
    %186 = arith.select %184, %185, %173 : vector<4x256xi1>, vector<4x256xf32>
    %cst_55 = arith.constant dense<0xFF800000> : vector<256xf32>
    %187 = vector.multi_reduction <maximumf>, %186, %cst_55 [0] : vector<4x256xf32> to vector<256xf32>
    %188 = vector.shape_cast %187 : vector<256xf32> to vector<1x256xf32>
    %189 = vector.broadcast %188 : vector<1x256xf32> to vector<4x256xf32>
    %190 = arith.cmpf oeq, %186, %189 : vector<4x256xf32>
    %c4_i32_56 = arith.constant 4 : i32
    %191 = vector.broadcast %c4_i32_56 : i32 to vector<4x256xi32>
    %192 = arith.select %190, %33, %191 : vector<4x256xi1>, vector<4x256xi32>
    %cst_57 = arith.constant dense<2147483647> : vector<256xi32>
    %193 = vector.multi_reduction <minsi>, %192, %cst_57 [0] : vector<4x256xi32> to vector<256xi32>
    %194 = vector.shape_cast %193 : vector<256xi32> to vector<1x256xi32>
    %195 = vector.broadcast %176 : vector<1x256xf32> to vector<4x256xf32>
    %196 = arith.subf %173, %195 : vector<4x256xf32>
    %197 = math.exp %196 : vector<4x256xf32>
    %cst_58 = arith.constant dense<0.000000e+00> : vector<256xf32>
    %198 = vector.multi_reduction <add>, %197, %cst_58 [0] : vector<4x256xf32> to vector<256xf32>
    %199 = vector.shape_cast %198 : vector<256xf32> to vector<1x256xf32>
    %cst_59 = arith.constant 1.000000e+00 : f32
    %200 = vector.broadcast %cst_59 : f32 to vector<1x256xf32>
    %201 = arith.divf %200, %199 : vector<1x256xf32>
    %202 = arith.subf %188, %176 : vector<1x256xf32>
    %203 = math.exp %202 : vector<1x256xf32>
    %cst_60 = arith.constant 0.000000e+00 : f32
    %204 = vector.broadcast %cst_60 : f32 to vector<4x256xf32>
    %205 = arith.select %184, %174, %204 : vector<4x256xi1>, vector<4x256xf32>
    %cst_61 = arith.constant dense<0.000000e+00> : vector<256xf32>
    %206 = vector.multi_reduction <add>, %205, %cst_61 [0] : vector<4x256xf32> to vector<256xf32>
    %207 = vector.shape_cast %206 : vector<256xf32> to vector<1x256xf32>
    %208 = arith.subi %182, %194 : vector<1x256xi32>
    %209 = arith.sitofp %208 : vector<1x256xi32> to vector<1x256xf32>
    %210 = math.absf %209 : vector<1x256xf32>
    %cst_62 = arith.constant 1.000000e+00 : f32
    %211 = vector.broadcast %cst_62 : f32 to vector<1x256xf32>
    %212 = arith.subf %210, %211 : vector<1x256xf32>
    %213 = arith.mulf %203, %212 : vector<1x256xf32>
    %cst_63 = arith.constant 1.000000e+00 : f32
    %214 = vector.broadcast %cst_63 : f32 to vector<1x256xf32>
    %215 = arith.addf %214, %213 : vector<1x256xf32>
    %216 = arith.mulf %201, %215 : vector<1x256xf32>
    %217 = arith.addf %171, %216 : vector<1x256xf32>
    %218 = arith.sitofp %182 : vector<1x256xi32> to vector<1x256xf32>
    %cst_64 = arith.constant 5.000000e-01 : f32
    %219 = vector.broadcast %cst_64 : f32 to vector<1x256xf32>
    %220 = arith.addf %219, %80 : vector<1x256xf32>
    %221 = arith.subf %220, %69 : vector<1x256xf32>
    %222 = arith.mulf %221, %30 : vector<1x256xf32>
    %223 = arith.addf %19, %222 : vector<1x256xf32>
    %cst_65 = arith.constant 5.000000e-01 : f32
    %224 = vector.broadcast %cst_65 : f32 to vector<1x256xf32>
    %225 = arith.addf %224, %126 : vector<1x256xf32>
    %226 = arith.addf %225, %115 : vector<1x256xf32>
    %227 = arith.mulf %226, %30 : vector<1x256xf32>
    %228 = arith.subf %22, %227 : vector<1x256xf32>
    %cst_66 = arith.constant 5.000000e-01 : f32
    %229 = vector.broadcast %cst_66 : f32 to vector<1x256xf32>
    %230 = arith.addf %229, %172 : vector<1x256xf32>
    %231 = arith.subf %230, %161 : vector<1x256xf32>
    %232 = arith.mulf %231, %32 : vector<1x256xf32>
    %233 = arith.addf %25, %232 : vector<1x256xf32>
    %cst_67 = arith.constant 5.000000e-01 : f32
    %234 = vector.broadcast %cst_67 : f32 to vector<1x256xf32>
    %235 = arith.addf %234, %218 : vector<1x256xf32>
    %236 = arith.addf %235, %207 : vector<1x256xf32>
    %237 = arith.mulf %236, %32 : vector<1x256xf32>
    %238 = arith.subf %28, %237 : vector<1x256xf32>
    %cst_68 = arith.constant 0.000000e+00 : f32
    %c79_i32 = arith.constant 79 : i32
    %239 = vector.broadcast %cst_68 : f32 to vector<1x256xf32>
    %240 = arith.maximumf %239, %223 : vector<1x256xf32>
    %241 = arith.sitofp %c79_i32 : i32 to f32
    %242 = vector.broadcast %241 : f32 to vector<1x256xf32>
    %243 = arith.minimumf %242, %240 : vector<1x256xf32>
    %cst_69 = arith.constant 0.000000e+00 : f32
    %c79_i32_70 = arith.constant 79 : i32
    %244 = vector.broadcast %cst_69 : f32 to vector<1x256xf32>
    %245 = arith.maximumf %244, %228 : vector<1x256xf32>
    %246 = arith.sitofp %c79_i32_70 : i32 to f32
    %247 = vector.broadcast %246 : f32 to vector<1x256xf32>
    %248 = arith.minimumf %247, %245 : vector<1x256xf32>
    %cst_71 = arith.constant 0.000000e+00 : f32
    %c63_i32 = arith.constant 63 : i32
    %249 = vector.broadcast %cst_71 : f32 to vector<1x256xf32>
    %250 = arith.maximumf %249, %233 : vector<1x256xf32>
    %251 = arith.sitofp %c63_i32 : i32 to f32
    %252 = vector.broadcast %251 : f32 to vector<1x256xf32>
    %253 = arith.minimumf %252, %250 : vector<1x256xf32>
    %cst_72 = arith.constant 0.000000e+00 : f32
    %c63_i32_73 = arith.constant 63 : i32
    %254 = vector.broadcast %cst_72 : f32 to vector<1x256xf32>
    %255 = arith.maximumf %254, %238 : vector<1x256xf32>
    %256 = arith.sitofp %c63_i32_73 : i32 to f32
    %257 = vector.broadcast %256 : f32 to vector<1x256xf32>
    %258 = arith.minimumf %257, %255 : vector<1x256xf32>
    %cst_74 = arith.constant 2.500000e-01 : f32
    %259 = vector.broadcast %cst_74 : f32 to vector<1x256xf32>
    %260 = arith.mulf %217, %259 : vector<1x256xf32>
    %cst_75 = arith.constant 0.000000e+00 : f32
    %261 = vector.broadcast %cst_75 : f32 to vector<3x256xf32>
    %262 = tpu.concatenate %243, %253, %248, %258, %260, %261 in 0 : vector<1x256xf32>, vector<1x256xf32>, vector<1x256xf32>, vector<1x256xf32>, vector<1x256xf32>, vector<3x256xf32> -> vector<8x256xf32>
    %c0_76 = arith.constant 0 : index
    %c0_77 = arith.constant 0 : index
    %263 = vector.load %arg4[%c0_76, %c0_77] : memref<8x256xf32, #tpu.memory_space<vmem>>, vector<8x256xf32>
    tpu.vector_store %arg4[%c0_76, %c0_77], %262 {strides = array<i32>} : memref<8x256xf32, #tpu.memory_space<vmem>>, vector<8x256xf32>,
    return
  }
  func.func @transform_0(%arg0: i32) -> (i32, i32) {
    %c0_i32 = arith.constant 0 : i32
    %c0_i32_0 = arith.constant 0 : i32
    return %arg0, %c0_i32 : i32, i32
  }
  func.func @transform_1(%arg0: i32) -> (i32, i32) {
    %c0_i32 = arith.constant 0 : i32
    %c0_i32_0 = arith.constant 0 : i32
    return %arg0, %c0_i32 : i32, i32
  }
  func.func @transform_2(%arg0: i32) -> (i32, i32) {
    %c0_i32 = arith.constant 0 : i32
    %c0_i32_0 = arith.constant 0 : i32
    return %c0_i32, %arg0 : i32, i32
  }
  func.func @transform_3(%arg0: i32) -> (i32, i32) {
    %c0_i32 = arith.constant 0 : i32
    %c0_i32_0 = arith.constant 0 : i32
    return %c0_i32, %arg0 : i32, i32
  }
}

</mosaic_0001>

<bundles_post_ra>
// kernel: tpu_custom_call.1
= control target key start
LH: loop header
LB: loop body
LE: loop exit
PB: predicated region body
PF: predicated region fallthrough
CT: control target
= control target key end

     0   :  { %8 = vsyncpa [#allocation3], 0  ;;  %s2064_s0 = inlined_call_operand.vmem [shape: f32[512,16], index: 0, kind: input, shape index: {}]   ;;  %s2065_s1 = inlined_call_operand.vmem [shape: f32[512,16], index: 1, kind: input, shape index: {}]   ;;  %s2066_s2 = inlined_call_operand.vmem [shape: f32[4,512], index: 2, kind: input, shape index: {}]   ;;  %s2067_s3 = inlined_call_operand.hbm [shape: f32[8,512], index: 3, kind: output, shape index: {}]  }
   0x1   :  { %10 = vsyncpa [#allocation3 + $0x1], 0  ;;  %s1472_s12 = smov 0   ;;  %s1474_s13 = smov 0  }
   0x2   :  { %s1476_s14 = smov 0   ;;  %s1478_s15 = smov 0  }
   0x3 LB: > { %s1493_s16 = sadd.s32 4294967295, %s1449_s15   ;;  %s1277_s17 = sadd.s32 4294967294, %s1449_s15   ;;  %s1449_s15 = sphi %s1478_s15, %s2075_s15   ;;  %s1445_s14 = sphi %s1476_s14, %s2074_s14   ;;  %s1441_s13 = sphi %s1474_s13, %s2073_s13   ;;  %s1437_s12 = sphi %s1472_s12, %s2072_s12  }
   0x4   : > { %s1497_s18 = sadd.s32 1, %s1449_s15   ;;  %s101_s19 = sadd.s32 1, %s1445_s14 }
   0x5   : > { %s98_s20 = ssub.s32 %s1449_s15, %s1497_s18  ;;  %p111_p0 = scmp.ne.s32.totalorder %s1445_s14, %s1441_s13 }
   0x6   : > { %p99_p1 = scmp.eq.s32.totalorder %s98_s20, 0  ;;  %p112_p2 = scmp.eq.s32.totalorder %s1493_s16, 1 }
   0x7   : > { %p117_p3 = scmp.ne.s32.totalorder %s1441_s13, %s1437_s12  ;;  %p118_p4 = scmp.eq.s32.totalorder %s1277_s17, 1 }
   0x8   : > { %s1508_s21 = scalar_select %p99_p1, %s1445_s14, %s101_s19  }
   0x9   : > { %p1510_p5 = por %p112_p2, %p111_p0  ;;  %p1514_p6 = por %p118_p4, %p117_p3 }
   0xa   : > { %p1280_p7 = scmp.ge.s32.totalorder %s1449_s15, 1  ;;  %p163_p8 = scmp.lt.s32.totalorder %s1449_s15, 3 }
   0xc   : > { %p164_p9 = pnand %p1280_p7, %p163_p8 }
   0xd   : > { %s1282_s24 = sshll.u32 (!%p164_p9), %s1493_s16, 5  ;;  %s1286_s5 = sshll.u32 (!%p164_p9), %s1493_s16, 1 }
   0xe   : > { %167 = sbr.rel (%p164_p9) target bundleno = 341 (0x155), region = 32  ;;  %p198_p10 = scmp.lt.s32.totalorder (!%p164_p9), %s1282_s24, 63 }
   0xf   : > { %p210_p11 = scmp.lt.s32.totalorder (!%p164_p9), %s1286_s5, 3  ;;  %s194_s10 = sand.u32 (!%p164_p9), 1, %s1441_s13  }
  0x10   : > { %s1281_s11 = sshll.u32 (!%p164_p9), %s194_s10, 4  ;;  %s1301_s19 = sshll.u32 (!%p164_p9), %s1493_s16, 8 }
  0x11   : > { %s196_s17 = scalar_lea.vmem (!%p164_p9), [#allocation2], %s1281_s11  ;;  %s2026_s26 = scalar_lea.hbm (!%p164_p9), %s2067_s3, %s1301_s19 }
  0x12   : > { %s1194_s20 = sshll.u32 (!%p164_p9), %s196_s17, 4  ;;  %s1180_s27 = scalar_lea.sflag (!%p164_p9), [#allocation3], %s194_s10  ;;  %s1195_s20 = int_to_ptr.vmem [resolvable:$true] %s1194_s20 }
  0x13   : > { %s2077_s24 = smov (!%p198_p10, %s1282_s24), 63  ;;  %s2079_s5 = smov (!%p210_p11, %s1286_s5), 3  ;;  %vm572_vm0 = vcmask 1047556   ;;  %vm427_vm1 = vcmask 1043456  }
  0x14   : > { %s1283_s25 = sshll.u32 %s2077_s24, 3  ;;  %s1287_s6 = sshll.u32 %s2079_s5, 2 }
  0x15   : > { %s1529_s28 = scalar_lea.vmem %s2064_s0, %s1283_s25  ;;  %s1568_s4 = scalar_lea.vmem %s2065_s1, %s1283_s25 }
  0x16   : > { %v232_v0 = vld [vmem:[%s1529_s28 + $0x80] sm:$0xff]  ;;  %v233_v2 = vld [vmem:[%s1529_s28 + $0x88] sm:$0xff]  ;;  %v234_v4 = vld [vmem:[%s1529_s28 + $0x90] sm:$0xff]  ;;  %s213_s9 = scalar_lea.vmem %s2066_s2, %s1287_s6  ;;  %s1451_s16 = smov [#allocation2]  }
  0x17   : > { %v216_v1 = vld [vmem:[%s1529_s28] sm:$0xff]  ;;  %280 = vxpose.xlu1.b32.start [1/16] (narrow) %v232_v0, 16  ;;  %v217_v3 = vld [vmem:[%s1529_s28 + $0x8] sm:$0xff]  ;;  %v218_v5 = vld [vmem:[%s1529_s28 + $0x10] sm:$0xff]  ;;  %s1393_s29 = sshll.u32 %s1451_s16, 4  ;;  %s1394_s29 = int_to_ptr.vmem [resolvable:$false] %s1393_s29 }
  0x18   : > { %248 = vxpose.xlu0.b32.start [1/16] (narrow) %v216_v1, 16  ;;  %v235_v6 = vld [vmem:[%s1529_s28 + $0x98] sm:$0xff]  ;;  %v236_v8 = vld [vmem:[%s1529_s28 + $0xa0] sm:$0xff]  ;;  %v237_v10 = vld [vmem:[%s1529_s28 + $0xa8] sm:$0xff]  ;;  %s1395_s30 = scalar_lea.vmem %s1394_s29, 512  ;;  %p1396_p1 = scmp.lt.s32.totalorder %s1195_s20, %s1394_s29 }
  0x19   : > { %v219_v7 = vld [vmem:[%s1529_s28 + $0x18] sm:$0xff]  ;;  %v220_v9 = vld [vmem:[%s1529_s28 + $0x20] sm:$0xff]  ;;  %v221_v11 = vld [vmem:[%s1529_s28 + $0x28] sm:$0xff] }
  0x1a   : > { %v238_v12 = vld [vmem:[%s1529_s28 + $0xb0] sm:$0xff]  ;;  %v239_v14 = vld [vmem:[%s1529_s28 + $0xb8] sm:$0xff]  ;;  %v240_v16 = vld [vmem:[%s1529_s28 + $0xc0] sm:$0xff] }
  0x1b   : > { %281 = vxpose.xlu1.b32.cont [2/16] (narrow) %v233_v2, 16  ;;  %v222_v13 = vld [vmem:[%s1529_s28 + $0x30] sm:$0xff]  ;;  %v223_v15 = vld [vmem:[%s1529_s28 + $0x38] sm:$0xff]  ;;  %v224_v17 = vld [vmem:[%s1529_s28 + $0x40] sm:$0xff] }
  0x1c   : > { %249 = vxpose.xlu0.b32.cont [2/16] (narrow) %v217_v3, 16  ;;  %v241_v18 = vld [vmem:[%s1529_s28 + $0xc8] sm:$0xff]  ;;  %v242_v20 = vld [vmem:[%s1529_s28 + $0xd0] sm:$0xff]  ;;  %v243_v22 = vld [vmem:[%s1529_s28 + $0xd8] sm:$0xff] }
  0x1d   : > { %v225_v19 = vld [vmem:[%s1529_s28 + $0x48] sm:$0xff]  ;;  %v226_v21 = vld [vmem:[%s1529_s28 + $0x50] sm:$0xff]  ;;  %v227_v23 = vld [vmem:[%s1529_s28 + $0x58] sm:$0xff] }
  0x1e   : > { %v244_v24 = vld [vmem:[%s1529_s28 + $0xe0] sm:$0xff]  ;;  %v245_v26 = vld [vmem:[%s1529_s28 + $0xe8] sm:$0xff]  ;;  %v246_v28 = vld [vmem:[%s1529_s28 + $0xf0] sm:$0xff] }
  0x1f   : > { %282 = vxpose.xlu1.b32.cont [3/16] (narrow) %v234_v4, 16  ;;  %v228_v25 = vld [vmem:[%s1529_s28 + $0x60] sm:$0xff]  ;;  %v229_v27 = vld [vmem:[%s1529_s28 + $0x68] sm:$0xff]  ;;  %v230_v29 = vld [vmem:[%s1529_s28 + $0x70] sm:$0xff] }
  0x20   : > { %250 = vxpose.xlu0.b32.cont [3/16] (narrow) %v218_v5, 16  ;;  %v247_v30 = vld [vmem:[%s1529_s28 + $0xf8] sm:$0xff]  ;;  %v328_v32 = vld [vmem:[%s1568_s4 + $0x80] sm:$0xff]  ;;  %v329_v34 = vld [vmem:[%s1568_s4 + $0x88] sm:$0xff] }
  0x21   : > { %v231_v31 = vld [vmem:[%s1529_s28 + $0x78] sm:$0xff]  ;;  %v312_v33 = vld [vmem:[%s1568_s4] sm:$0xff]  ;;  %v313_v35 = vld [vmem:[%s1568_s4 + $0x8] sm:$0xff]  ;;  %s1389_s28 = scalar_lea.vmem %s1195_s20, 256 }
  0x22   : > { %v330_v36 = vld [vmem:[%s1568_s4 + $0x90] sm:$0xff]  ;;  %v331_v38 = vld [vmem:[%s1568_s4 + $0x98] sm:$0xff]  ;;  %v332_v40 = vld [vmem:[%s1568_s4 + $0xa0] sm:$0xff]  ;;  %p1390_p12 = scmp.ne.s32.totalorder %s1195_s20, %s1389_s28  ;;  %p1397_p2 = scmp.lt.s32.totalorder %s1395_s30, %s1389_s28 }
  0x23   : > { %283 = vxpose.xlu1.b32.cont [4/16] (narrow) %v235_v6, 16  ;;  %v314_v37 = vld [vmem:[%s1568_s4 + $0x10] sm:$0xff]  ;;  %v315_v39 = vld [vmem:[%s1568_s4 + $0x18] sm:$0xff]  ;;  %v316_v41 = vld [vmem:[%s1568_s4 + $0x20] sm:$0xff] }
  0x24   : > { %251 = vxpose.xlu0.b32.cont [4/16] (narrow) %v219_v7, 16  ;;  %v333_v42 = vld [vmem:[%s1568_s4 + $0xa8] sm:$0xff]  ;;  %v334_v44 = vld [vmem:[%s1568_s4 + $0xb0] sm:$0xff]  ;;  %v335_v46 = vld [vmem:[%s1568_s4 + $0xb8] sm:$0xff]  ;;  %p1391_p13 = pnand %p1390_p12, %p1510_p5  ;;  %p1398_p3 = por %p1397_p2, %p1396_p1 }
  0x25   : > { %v317_v43 = vld [vmem:[%s1568_s4 + $0x28] sm:$0xff]  ;;  %v318_v45 = vld [vmem:[%s1568_s4 + $0x30] sm:$0xff]  ;;  %v319_v47 = vld [vmem:[%s1568_s4 + $0x38] sm:$0xff] }
  0x26   : > { %v336_v48 = vld [vmem:[%s1568_s4 + $0xc0] sm:$0xff]  ;;  %v337_v50 = vld [vmem:[%s1568_s4 + $0xc8] sm:$0xff]  ;;  %v338_v52 = vld [vmem:[%s1568_s4 + $0xd0] sm:$0xff]  ;;  %p1392_p0 = pneg %p1391_p13 }
  0x27   : > { %284 = vxpose.xlu1.b32.cont [5/16] (narrow) %v236_v8, 16  ;;  %v320_v49 = vld [vmem:[%s1568_s4 + $0x40] sm:$0xff]  ;;  %v321_v51 = vld [vmem:[%s1568_s4 + $0x48] sm:$0xff]  ;;  %v322_v53 = vld [vmem:[%s1568_s4 + $0x50] sm:$0xff] }
  0x28   : > { %252 = vxpose.xlu0.b32.cont [5/16] (narrow) %v220_v9, 16  ;;  %v339_v54 = vld [vmem:[%s1568_s4 + $0xd8] sm:$0xff]  ;;  %v340_v56 = vld [vmem:[%s1568_s4 + $0xe0] sm:$0xff]  ;;  %v341_v58 = vld [vmem:[%s1568_s4 + $0xe8] sm:$0xff]  ;;  %v425_v9 = vlaneseq  ;;  %p1399_p4 = pnand %p1398_p3, %p1392_p0 }
  0x29   : > { %v323_v55 = vld [vmem:[%s1568_s4 + $0x58] sm:$0xff]  ;;  %v324_v57 = vld [vmem:[%s1568_s4 + $0x60] sm:$0xff]  ;;  %v325_v59 = vld [vmem:[%s1568_s4 + $0x68] sm:$0xff] }
  0x2a   : > { %v342_v60 = vld [vmem:[%s1568_s4 + $0xf0] sm:$0xff]  ;;  %v343_v62 = vld [vmem:[%s1568_s4 + $0xf8] sm:$0xff] }
  0x2b   : > { %285 = vxpose.xlu1.b32.cont [6/16] (narrow) %v237_v10, 16  ;;  %v326_v61 = vld [vmem:[%s1568_s4 + $0x70] sm:$0xff]  ;;  %v327_v63 = vld [vmem:[%s1568_s4 + $0x78] sm:$0xff] }
  0x2c   : > { %253 = vxpose.xlu0.b32.cont [6/16] (narrow) %v221_v11, 16  ;;  %v1618_v11 = vld [vmem:[%s213_s9] sm:$0xff] }
  0x2f   : > { %286 = vxpose.xlu1.b32.cont [7/16] (narrow) %v238_v12, 16 }
  0x30   : > { %254 = vxpose.xlu0.b32.cont [7/16] (narrow) %v222_v13, 16 }
  0x33   : > { %287 = vxpose.xlu1.b32.cont [8/16] (narrow) %v239_v14, 16 }
  0x34   : > { %255 = vxpose.xlu0.b32.cont [8/16] (narrow) %v223_v15, 16 }
  0x37   : > { %288 = vxpose.xlu1.b32.cont [9/16] (narrow) %v240_v16, 16 }
  0x38   : > { %256 = vxpose.xlu0.b32.cont [9/16] (narrow) %v224_v17, 16 }
  0x3b   : > { %289 = vxpose.xlu1.b32.cont [10/16] (narrow) %v241_v18, 16 }
  0x3c   : > { %257 = vxpose.xlu0.b32.cont [10/16] (narrow) %v225_v19, 16  ;;  %v410_v19 = vrot.slane %v1618_v11, 6 }
  0x3f   : > { %290 = vxpose.xlu1.b32.cont [11/16] (narrow) %v242_v20, 16  ;;  %v1621_v20 = vshrl.u32 %v425_v9, 7 }
  0x40   : > { %258 = vxpose.xlu0.b32.cont [11/16] (narrow) %v226_v21, 16 }
  0x43   : > { %291 = vxpose.xlu1.b32.cont [12/16] (narrow) %v243_v22, 16 }
  0x44   : > { %259 = vxpose.xlu0.b32.cont [12/16] (narrow) %v227_v23, 16 }
  0x47   : > { %292 = vxpose.xlu1.b32.cont [13/16] (narrow) %v244_v24, 16 }
  0x48   : > { %260 = vxpose.xlu0.b32.cont [13/16] (narrow) %v228_v25, 16 }
  0x4b   : > { %293 = vxpose.xlu1.b32.cont [14/16] (narrow) %v245_v26, 16 }
  0x4c   : > { %261 = vxpose.xlu0.b32.cont [14/16] (narrow) %v229_v27, 16 }
  0x4f   : > { %294 = vxpose.xlu1.b32.cont [15/16] (narrow) %v246_v28, 16 }
  0x50   : > { %262 = vxpose.xlu0.b32.cont [15/16] (narrow) %v230_v29, 16  ;;  %v416_v29 = vsub.f32 %v1618_v11, %v410_v19 }
  0x53   : > { %295 = vxpose.xlu1.b32.end [16/16] (narrow) %v247_v30, 16  ;;  %v1625_v30 = vrot.slane %v1621_v20, 4 }
  0x54   : > { %263 = vxpose.xlu0.b32.end [16/16] (narrow) %v231_v31, 16 }
  0x57   : > { %376 = vxpose.xlu1.b32.start [1/16] (narrow) %v328_v32, 16 }
  0x58   : > { %344 = vxpose.xlu0.b32.start [1/16] (narrow) %v312_v33, 16 }
  0x5b   : > { %377 = vxpose.xlu1.b32.cont [2/16] (narrow) %v329_v34, 16 }
  0x5c   : > { %345 = vxpose.xlu0.b32.cont [2/16] (narrow) %v313_v35, 16 }
  0x5f   : > { %378 = vxpose.xlu1.b32.cont [3/16] (narrow) %v330_v36, 16  ;;  %v1639_v36 = vmul.f32 0.1875, %v416_v29 }
  0x60   : > { %346 = vxpose.xlu0.b32.cont [3/16] (narrow) %v314_v37, 16 }
  0x63   : > { %379 = vxpose.xlu1.b32.cont [4/16] (narrow) %v331_v38, 16 }
  0x64   : > { %347 = vxpose.xlu0.b32.cont [4/16] (narrow) %v315_v39, 16 }
  0x67   : > { %380 = vxpose.xlu1.b32.cont [5/16] (narrow) %v332_v40, 16 }
  0x68   : > { %348 = vxpose.xlu0.b32.cont [5/16] (narrow) %v316_v41, 16 }
  0x6b   : > { %381 = vxpose.xlu1.b32.cont [6/16] (narrow) %v333_v42, 16 }
  0x6c   : > { %349 = vxpose.xlu0.b32.cont [6/16] (narrow) %v317_v43, 16 }
  0x6f   : > { %382 = vxpose.xlu1.b32.cont [7/16] (narrow) %v334_v44, 16  ;;  %v411_v44 = vrot.slane %v410_v19, 4 }
  0x70   : > { %350 = vxpose.xlu0.b32.cont [7/16] (narrow) %v318_v45, 16 }
  0x71   : > { %v413_v9 = vadd.f32 %v411_v44, %v1618_v11 }
  0x73   : > { %383 = vxpose.xlu1.b32.cont [8/16] (narrow) %v335_v46, 16 }
  0x74   : > { %351 = vxpose.xlu0.b32.cont [8/16] (narrow) %v319_v47, 16 }
  0x77   : > { %384 = vxpose.xlu1.b32.cont [9/16] (narrow) %v336_v48, 16 }
  0x78   : > { %352 = vxpose.xlu0.b32.cont [9/16] (narrow) %v320_v49, 16 }
  0x7b   : > { %385 = vxpose.xlu1.b32.cont [10/16] (narrow) %v337_v50, 16 }
  0x7c   : > { %353 = vxpose.xlu0.b32.cont [10/16] (narrow) %v321_v51, 16  ;;  %v417_v51 = vmul.f32 0.75, %v416_v29 }
  0x7e   : > { %v419_v11 = vrot.slane %v417_v51, 6 }
  0x7f   : > { %386 = vxpose.xlu1.b32.cont [11/16] (narrow) %v338_v52, 16 }
  0x80   : > { %354 = vxpose.xlu0.b32.cont [11/16] (narrow) %v322_v53, 16  ;;  %v420_v29 = vrot.slane %v419_v11, 4 }
  0x83   : > { %387 = vxpose.xlu1.b32.cont [12/16] (narrow) %v339_v54, 16 }
  0x84   : > { %355 = vxpose.xlu0.b32.cont [12/16] (narrow) %v323_v55, 16 }
  0x87   : > { %388 = vxpose.xlu1.b32.cont [13/16] (narrow) %v340_v56, 16 }
  0x88   : > { %356 = vxpose.xlu0.b32.cont [13/16] (narrow) %v324_v57, 16 }
  0x8b   : > { %389 = vxpose.xlu1.b32.cont [14/16] (narrow) %v341_v58, 16 }
  0x8c   : > { %357 = vxpose.xlu0.b32.cont [14/16] (narrow) %v325_v59, 16 }
  0x8f   : > { %390 = vxpose.xlu1.b32.cont [15/16] (narrow) %v342_v60, 16 }
  0x90   : > { %358 = vxpose.xlu0.b32.cont [15/16] (narrow) %v326_v61, 16 }
  0x93   : > { %391 = vxpose.xlu1.b32.end [16/16] (narrow) %v343_v62, 16  ;;  %v1603_v0 = vpop.trf.xlu1 }
  0x94   : > { %359 = vxpose.xlu0.b32.end [16/16] (narrow) %v327_v63, 16  ;;  %v1605_v1 = vpop.trf.xlu0  ;;  %v580_v2 = vsel %vm572_vm0, %v1603_v0, -inf  ;;  %v435_v4 = vsel %vm427_vm1, %v1603_v0, -inf }
  0x95   : > { %v573_v3 = vsel %vm572_vm0, %v1605_v1, -inf  ;;  %v581_v5 = vrot.slane %v580_v2, 4  ;;  %v436_v7 = vrot.slane %v435_v4, 4  ;;  %v428_v8 = vsel %vm427_vm1, %v1605_v1, -inf }
  0x96   : > { %v574_v6 = vrot.slane %v573_v3, 4  ;;  %v429_v10 = vrot.slane %v428_v8, 4 }
  0x97   : > { %v437_v12 = vmax.f32 %v435_v4, %v436_v7  ;;  %v582_v13 = vmax.f32 %v580_v2, %v581_v5  ;;  %v1658_v50 = vpop.trf.xlu1 }
  0x98   : > { %v575_v14 = vmax.f32 %v573_v3, %v574_v6  ;;  %v430_v15 = vmax.f32 %v428_v8, %v429_v10  ;;  %v743_v63 = vsel %vm427_vm1, %v1658_v50, -inf }
  0x99   : > { %v438_v16 = vrot.slane %v437_v12, 2  ;;  %v583_v17 = vrot.slane %v582_v13, 2 }
  0x9a   : > { %v576_v18 = vrot.slane %v575_v14, 2  ;;  %v431_v21 = vrot.slane %v430_v15, 2 }
  0x9b   : > { %v439_v22 = vmax.f32 %v437_v12, %v438_v16  ;;  %v584_v23 = vmax.f32 %v582_v13, %v583_v17  ;;  %v744_v12 = vrot.slane %v743_v63, 4  ;;  %v617_v16 = vrot.slane %v1603_v0, 4 }
  0x9c   : > { %v577_v24 = vmax.f32 %v575_v14, %v576_v18  ;;  %v432_v25 = vmax.f32 %v430_v15, %v431_v21  ;;  %v1053_v17 = vsub.s32 6, %v1621_v20 }
  0x9d   : > { %v440_v26 = vrot.slane %v439_v22, 1  ;;  %v585_v27 = vrot.slane %v584_v23, 1 }
  0x9e   : > { %v578_v28 = vrot.slane %v577_v24, 1  ;;  %v433_v31 = vrot.slane %v432_v25, 1 }
  0x9f   : > { %v1627_v32 = vmax.f32 %v439_v22, %v440_v26  ;;  %v1629_v33 = vmax.f32 %v584_v23, %v585_v27 }
  0xa0   : > { %v1631_v34 = vmax.f32 %v577_v24, %v578_v28  ;;  %v1633_v35 = vmax.f32 %v432_v25, %v433_v31  ;;  %v414_v24 = vmul.f32 0.5, %v413_v9  ;;  %v745_v25 = vmax.f32 %v743_v63, %v744_v12 }
  0xa1   : > { %vm443_vm2 = vcmp.eq.f32.partialorder %v1603_v0, %v1627_v32  ;;  %vm588_vm3 = vcmp.eq.f32.partialorder %v1603_v0, %v1629_v33  ;;  %v661_v41 = vsub.f32 %v1603_v0, %v1629_v33  ;;  %v509_v46 = vsub.f32 %v1603_v0, %v1627_v32 }
  0xa2   : > { %v445_v37 = vsel %vm443_vm2, %v1621_v20, 4  ;;  %v591_v38 = vsel %vm588_vm3, %v1625_v30, 4  ;;  %vm442_vm4 = vcmp.eq.f32.partialorder %v1605_v1, %v1633_v35  ;;  %vm587_vm5 = vcmp.eq.f32.partialorder %v1605_v1, %v1631_v34 }
  0xa3   : > { %v456_v39 = vsel %vm427_vm1, %v445_v37, 2147483647  ;;  %v602_v40 = vsel %vm572_vm0, %v591_v38, 2147483647  ;;  %v444_v45 = vsel %vm442_vm4, %v1621_v20, 4  ;;  %v508_v48 = vsub.f32 %v1605_v1, %v1633_v35 }
  0xa4   : > { %v457_v42 = vrot.slane %v456_v39, 4  ;;  %v603_v43 = vrot.slane %v602_v40, 4  ;;  %v446_v47 = vsel %vm427_vm1, %v444_v45, 2147483647  ;;  %v590_v49 = vsel %vm587_vm5, %v1625_v30, 4 }
  0xa5   : > { %v447_v52 = vrot.slane %v446_v47, 4  ;;  %v664_v55 = vmul.f32 1.442695, %v661_v41  ;;  %v592_v56 = vsel %vm572_vm0, %v590_v49, 2147483647  ;;  %v660_v37 = vsub.f32 %v1605_v1, %v1631_v34 }
  0xa6   : > { %vm458_vm6 = vcmp.lt.s32.totalorder %v456_v39, %v457_v42  ;;  %vm604_vm7 = vcmp.lt.s32.totalorder %v602_v40, %v603_v43  ;;  %v593_v59 = vrot.slane %v592_v56, 4  ;;  %v512_v60 = vmul.f32 1.442695, %v509_v46 }
  0xa7   : > { %v459_v53 = vsel %vm458_vm6, %v456_v39, %v457_v42  ;;  %v605_v54 = vsel %vm604_vm7, %v602_v40, %v603_v43  ;;  %vm448_vm8 = vcmp.lt.s32.totalorder %v446_v47, %v447_v52  ;;  %v510_v62 = vmul.f32 1.442695, %v508_v48 }
  0xa8   : > { %v460_v57 = vrot.slane %v459_v53, 2  ;;  %v606_v58 = vrot.slane %v605_v54, 2  ;;  %v449_v61 = vsel %vm448_vm8, %v446_v47, %v447_v52  ;;  %vm594_vm11 = vcmp.lt.s32.totalorder %v592_v56, %v593_v59 }
  0xa9   : > { %v450_v2 = vrot.slane %v449_v61, 2  ;;  %1341 = vpow2.f32 %v664_v55  ;;  %v595_v5 = vsel %vm594_vm11, %v592_v56, %v593_v59  ;;  %v746_v42 = vrot.slane %v745_v25, 2 }
  0xaa   : > { %vm461_vm9 = vcmp.lt.s32.totalorder %v459_v53, %v460_v57  ;;  %vm607_vm10 = vcmp.lt.s32.totalorder %v605_v54, %v606_v58  ;;  %v596_v8 = vrot.slane %v595_v5, 2  ;;  %1343 = vpow2.f32 %v512_v60 }
  0xab   : > { %v462_v3 = vsel %vm461_vm9, %v459_v53, %v460_v57  ;;  %v608_v4 = vsel %vm607_vm10, %v605_v54, %v606_v58  ;;  %vm451_vm12 = vcmp.lt.s32.totalorder %v449_v61, %v450_v2  ;;  %1345 = vpow2.f32 %v510_v62  ;;  %v1716_v62 = vpop.trf.xlu0 }
  0xac   : > { %v463_v6 = vrot.slane %v462_v3, 1  ;;  %v609_v7 = vrot.slane %v608_v4, 1  ;;  %v452_v10 = vsel %vm451_vm12, %v449_v61, %v450_v2  ;;  %vm597_vm15 = vcmp.lt.s32.totalorder %v595_v5, %v596_v8 }
  0xad   : > { %v453_v13 = vrot.slane %v452_v10, 1  ;;  %v598_v21 = vsel %vm597_vm15, %v595_v5, %v596_v8  ;;  %v1706_v46 = vrot.slane %v1639_v36, %v1053_v17  ;;  %v1708_v49 = vsub.f32 %v414_v24, %v420_v29 }
  0xae   : > { %vm464_vm13 = vcmp.lt.s32.totalorder %v462_v3, %v463_v6  ;;  %vm610_vm14 = vcmp.lt.s32.totalorder %v608_v4, %v609_v7  ;;  %v599_v31 = vrot.slane %v598_v21, 1  ;;  %v662_v51 = vmul.f32 1.442695, %v660_v37 }
  0xaf   : > { %v1664_v14 = vsel %vm464_vm13, %v462_v3, %v463_v6  ;;  %v1666_v15 = vsel %vm610_vm14, %v608_v4, %v609_v7  ;;  %vm454_vm4 = vcmp.lt.s32.totalorder %v452_v10, %v453_v13  ;;  %v1049_v52 = vsub.s32 2, %v1621_v20 }
  0xb0   : > { %vm467_vm2 = vcmp.eq.s32.totalorder %v1621_v20, %v1664_v14  ;;  %vm613_vm3 = vcmp.eq.s32.totalorder %v1621_v20, %v1666_v15  ;;  %v1689_v28 = vsel %vm454_vm4, %v452_v10, %v453_v13  ;;  %vm600_vm6 = vcmp.lt.s32.totalorder %v598_v21, %v599_v31 }
  0xb1   : > { %v1678_v18 = vsel %vm467_vm2, -1e+30, %v1603_v0  ;;  %v1683_v19 = vsel %vm613_vm3, -1e+30, %v617_v16  ;;  %v887_v0 = vsel %vm572_vm0, %v1658_v50, -inf  ;;  %vm466_vm5 = vcmp.eq.s32.totalorder %v1621_v20, %v1689_v28 }
  0xb2   : > { %v477_v22 = vsel %vm427_vm1, %v1678_v18, -inf  ;;  %v629_v23 = vsel %vm427_vm1, %v1683_v19, -inf  ;;  %v1701_v40 = vsel %vm466_vm5, -1e+30, %v1605_v1  ;;  %v888_v43 = vrot.slane %v887_v0, 4 }
  0xb3   : > { %v478_v26 = vrot.slane %v477_v22, 4  ;;  %v630_v27 = vrot.slane %v629_v23, 4  ;;  %v470_v41 = vsel %vm427_vm1, %v1701_v40, -inf  ;;  %v1711_v55 = vadd.f32 %v420_v29, %v414_v24 }
  0xb4   : > { %v471_v47 = vrot.slane %v470_v41, 4  ;;  %v1713_v58 = vsel %vm600_vm6, %v598_v21, %v599_v31  ;;  %v1126_v59 = vsub.s32 4, %v1621_v20  ;;  %v747_v60 = vmax.f32 %v745_v25, %v746_v42 }
  0xb5   : > { %v479_v38 = vmax.f32 %v477_v22, %v478_v26  ;;  %v631_v39 = vmax.f32 %v629_v23, %v630_v27  ;;  %v889_v61 = vmax.f32 %v887_v0, %v888_v43  ;;  %v616_v5 = vrot.slane %v1605_v1, 4 }
  0xb6   : > { %v1342_v48 = vpop.eup %1341  ;;  %v472_v56 = vmax.f32 %v470_v41, %v471_v47  ;;  %1347 = vpow2.f32 %v662_v51  ;;  %v1720_v6 = vrot.slane %v1639_v36, %v1049_v52  ;;  %v923_v7 = vrot.slane %v1658_v50, 4 }
  0xb7   : > { %v480_v44 = vrot.slane %v479_v38, 2  ;;  %v632_v45 = vrot.slane %v631_v39, 2  ;;  %v1344_v57 = vpop.eup %1343  ;;  %v669_v3 = vrot.slane %v1342_v48, 4  ;;  %vm612_vm7 = vcmp.eq.s32.totalorder %v1621_v20, %v1713_v58 }
  0xb8   : > { %v473_v4 = vrot.slane %v472_v56, 2  ;;  %v1346_v8 = vpop.eup %1345  ;;  %v521_v10 = vsel %vm427_vm1, %v1344_v57, 0.0  ;;  %v890_v16 = vrot.slane %v889_v61, 2  ;;  %v736_v1 = vsel %vm427_vm1, %v1716_v62, -inf }
  0xb9   : > { %v481_v53 = vmax.f32 %v479_v38, %v480_v44  ;;  %v633_v54 = vmax.f32 %v631_v39, %v632_v45  ;;  %v880_v17 = vsel %vm572_vm0, %v1716_v62, -inf  ;;  %v679_v11 = vsel %vm427_vm1, %v669_v3, 0.0 }
  0xba   : > { %v474_v13 = vmax.f32 %v472_v56, %v473_v4  ;;  %v748_v21 = vrot.slane %v747_v60, 1  ;;  %v522_v23 = vrot.slane %v521_v10, 4  ;;  %v1744_v25 = vsel %vm612_vm7, -1e+30, %v616_v5 }
  0xbb   : > { %v482_v63 = vrot.slane %v481_v53, 1  ;;  %v634_v2 = vrot.slane %v633_v54, 1  ;;  %v514_v27 = vsel %vm427_vm1, %v1346_v8, 0.0  ;;  %v680_v31 = vrot.slane %v679_v11, 4 }
  0xbc   : > { %v475_v37 = vrot.slane %v474_v13, 1  ;;  %v622_v38 = vsel %vm427_vm1, %v1744_v25, -inf  ;;  %v1751_v39 = vmax.f32 %v747_v60, %v748_v21  ;;  %v891_v41 = vmax.f32 %v889_v61, %v890_v16 }
  0xbd   : > { %v1723_v9 = vmax.f32 %v481_v53, %v482_v63  ;;  %v1726_v12 = vmax.f32 %v633_v54, %v634_v2  ;;  %v881_v42 = vrot.slane %v880_v17, 4  ;;  %v523_v43 = vadd.f32 %v522_v23, %v521_v10 }
  0xbe   : > { %v1753_v44 = vmax.f32 %v474_v13, %v475_v37  ;;  %v515_v48 = vrot.slane %v514_v27, 4  ;;  %v623_v51 = vrot.slane %v622_v38, 4  ;;  %v681_v54 = vadd.f32 %v680_v31, %v679_v11 }
  0xbf   : > { %vm485_vm8 = vcmp.eq.f32.partialorder %v1678_v18, %v1723_v9  ;;  %vm637_vm9 = vcmp.eq.f32.partialorder %v1683_v19, %v1726_v12  ;;  %v737_v19 = vrot.slane %v736_v1, 4  ;;  %v1760_v61 = vmax.f32 %v880_v17, %v881_v42 }
  0xc0   : > { %v487_v22 = vsel %vm485_vm8, %v1621_v20, 4  ;;  %v639_v24 = vsel %vm637_vm9, %v1621_v20, 4  ;;  %vm484_vm12 = vcmp.eq.f32.partialorder %v1701_v40, %v1753_v44  ;;  %v624_v57 = vmax.f32 %v622_v38, %v623_v51 }
  0xc1   : > { %v498_v26 = vsel %vm427_vm1, %v487_v22, 2147483647  ;;  %v650_v18 = vsel %vm427_vm1, %v639_v24, 2147483647  ;;  %v486_v56 = vsel %vm484_vm12, %v1621_v20, 4  ;;  %v1758_v60 = vmax.f32 %v736_v1, %v737_v19 }
  0xc2   : > { %v499_v0 = vrot.slane %v498_v26, 4  ;;  %v651_v29 = vrot.slane %v650_v18, 4  ;;  %v524_v63 = vrot.slane %v523_v43, 2  ;;  %v488_v2 = vsel %vm427_vm1, %v486_v56, 2147483647 }
  0xc3   : > { %v1348_v3 = vpop.eup %1347  ;;  %v489_v8 = vrot.slane %v488_v2, 4  ;;  %v516_v10 = vadd.f32 %v515_v48, %v514_v27  ;;  %v682_v13 = vrot.slane %v681_v54, 2  ;;  %v625_v16 = vrot.slane %v624_v57, 2 }
  0xc4   : > { %vm500_vm10 = vcmp.lt.s32.totalorder %v498_v26, %v499_v0  ;;  %vm652_vm11 = vcmp.lt.s32.totalorder %v650_v18, %v651_v29  ;;  %vm751_vm15 = vcmp.eq.f32.partialorder %v1658_v50, %v1751_v39  ;;  %v892_v40 = vrot.slane %v891_v41, 1 }
  0xc5   : > { %v501_v45 = vsel %vm500_vm10, %v498_v26, %v499_v0  ;;  %v653_v47 = vsel %vm652_vm11, %v650_v18, %v651_v29  ;;  %v571_v17 = vcvt.s32.f32 %v1664_v14  ;;  %v1085_v11 = vsub.s32 7, %v1621_v20 }
  0xc6   : > { %v502_v52 = vrot.slane %v501_v45, 2  ;;  %v654_v53 = vrot.slane %v653_v47, 2  ;;  %v739_v21 = vrot.slane %v1758_v60, 2  ;;  %v525_v22 = vadd.f32 %v524_v63, %v523_v43 }
  0xc7   : > { %v735_v24 = vcvt.s32.f32 %v1666_v15  ;;  %v626_v26 = vmax.f32 %v624_v57, %v625_v16  ;;  %vm490_vm4 = vcmp.lt.s32.totalorder %v488_v2, %v489_v8  ;;  %v517_v18 = vrot.slane %v516_v10, 2 }
  0xc8   : > { %vm503_vm13 = vcmp.lt.s32.totalorder %v501_v45, %v502_v52  ;;  %vm655_vm14 = vcmp.lt.s32.totalorder %v653_v47, %v654_v53  ;;  %v668_v27 = vrot.slane %v1348_v3, 4  ;;  %v753_v19 = vsel %vm751_vm15, %v1621_v20, 4 }
  0xc9   : > { %v504_v4 = vsel %vm503_vm13, %v501_v45, %v502_v52  ;;  %v656_v5 = vsel %vm655_vm14, %v653_v47, %v654_v53  ;;  %v533_v0 = vsub.f32 %v1723_v9, %v1627_v32  ;;  %v683_v29 = vadd.f32 %v682_v13, %v681_v54 }
  0xca   : > { %v505_v1 = vrot.slane %v504_v4, 1  ;;  %v657_v23 = vrot.slane %v656_v5, 1  ;;  %v627_v31 = vrot.slane %v626_v26, 1  ;;  %v1772_v37 = vmax.f32 %v891_v41, %v892_v40 }
  0xcb   : > { %v691_v38 = vsub.f32 %v1726_v12, %v1629_v33  ;;  %v1776_v42 = vadd.f32 0.5, %v571_v17  ;;  %v570_v43 = vcvt.s32.f32 %v1689_v28  ;;  %v491_v45 = vsel %vm490_vm4, %v488_v2, %v489_v8 }
  0xcc   : > { %vm506_vm6 = vcmp.lt.s32.totalorder %v504_v4, %v505_v1  ;;  %vm658_vm8 = vcmp.lt.s32.totalorder %v656_v5, %v657_v23  ;;  %v1779_v47 = vmax.f32 %v626_v26, %v627_v31  ;;  %v764_v48 = vsel %vm427_vm1, %v753_v19, 2147483647 }
  0xcd   : > { %v526_v51 = vrot.slane %v525_v22, 1  ;;  %v1782_v32 = vadd.f32 0.5, %v735_v24  ;;  %v518_v9 = vadd.f32 %v517_v18, %v516_v10  ;;  %v672_v41 = vsel %vm427_vm1, %v668_v27, 0.0 }
  0xce   : > { %v507_v52 = vsel %vm506_vm6, %v504_v4, %v505_v1  ;;  %v536_v53 = vmul.f32 1.442695, %v533_v0  ;;  %v684_v54 = vrot.slane %v683_v29, 1  ;;  %vm636_vm9 = vcmp.eq.f32.partialorder %v1744_v25, %v1779_v47 }
  0xcf   : > { %v659_v33 = vsel %vm658_vm8, %v656_v5, %v657_v23  ;;  %v492_v56 = vrot.slane %v491_v45, 2  ;;  %v638_v57 = vsel %vm636_vm9, %v1621_v20, 4  ;;  %v765_v63 = vrot.slane %v764_v48, 4 }
  0xd0   : > { %v694_v2 = vmul.f32 1.442695, %v691_v38  ;;  %v673_v8 = vrot.slane %v672_v41, 4  ;;  %v1788_v13 = vadd.f32 0.5, %v570_v43  ;;  %v527_v10 = vadd.f32 %v526_v51, %v525_v22 }
  0xd1   : > { %v519_v16 = vrot.slane %v518_v9, 1  ;;  %v640_v40 = vsel %vm427_vm1, %v638_v57, 2147483647  ;;  %v555_v25 = vsub.s32 %v1664_v14, %v507_v52  ;;  %v685_v5 = vadd.f32 %v684_v54, %v683_v29 }
  0xd2   : > { %v719_v1 = vsub.s32 %v1666_v15, %v659_v33  ;;  %1349 = vpow2.f32 %v536_v53  ;;  %vm493_vm10 = vcmp.lt.s32.totalorder %v491_v45, %v492_v56  ;;  %v641_v22 = vrot.slane %v640_v40, 4 }
  0xd3   : > { %v392_v12 = vpop.trf.xlu1  ;;  %vm766_vm11 = vcmp.lt.s32.totalorder %v764_v48, %v765_v63  ;;  %1351 = vpow2.f32 %v694_v2  ;;  %v532_v26 = vsub.f32 %v1753_v44, %v1633_v35  ;;  %v674_v18 = vadd.f32 %v673_v8, %v672_v41 }
  0xd4   : > { %v699_v3 = vrot.slane %v392_v12, 4  ;;  %v539_v4 = vsel %vm467_vm2, %v392_v12, 0.0  ;;  %v360_v23 = vpop.trf.xlu0  ;;  %vm642_vm2 = vcmp.lt.s32.totalorder %v640_v40, %v641_v22  ;;  %v557_v19 = vcvt.s32.f32 %v555_v25 }
  0xd5   : > { %v547_v24 = vsel %vm427_vm1, %v539_v4, 0.0  ;;  %v538_v15 = vsel %vm466_vm5, %v360_v23, 0.0  ;;  %v698_v27 = vrot.slane %v360_v23, 4  ;;  %v721_v0 = vcvt.s32.f32 %v719_v1 }
  0xd6   : > { %v703_v17 = vsel %vm613_vm3, %v699_v3, 0.0  ;;  %v494_v29 = vsel %vm493_vm10, %v491_v45, %v492_v56  ;;  %v767_v31 = vsel %vm766_vm11, %v764_v48, %v765_v63  ;;  %v548_v38 = vrot.slane %v547_v24, 4 }
  0xd7   : > { %v711_v14 = vsel %vm427_vm1, %v703_v17, 0.0  ;;  %v643_v43 = vsel %vm642_vm2, %v640_v40, %v641_v22  ;;  %v540_v51 = vsel %vm427_vm1, %v538_v15, 0.0  ;;  %v702_v35 = vsel %vm612_vm7, %v698_v27, 0.0 }
  0xd8   : > { %1353 = vrcp.f32 %v527_v10  ;;  %v712_v44 = vrot.slane %v711_v14, 4  ;;  %v520_v41 = vadd.f32 %v519_v16, %v518_v9  ;;  %v675_v52 = vrot.slane %v674_v18, 2 }
  0xd9   : > { %1355 = vrcp.f32 %v685_v5  ;;  %v495_v53 = vrot.slane %v494_v29, 1  ;;  %v704_v54 = vsel %vm427_vm1, %v702_v35, 0.0  ;;  %v768_v33 = vrot.slane %v767_v31, 2 }
  0xda   : > { %v559_v12 = vand.u32 2147483647, %v557_v19  ;;  %v723_v45 = vand.u32 2147483647, %v721_v0  ;;  %v644_v48 = vrot.slane %v643_v43, 2  ;;  %v541_v56 = vrot.slane %v540_v51, 4 }
  0xdb   : > { %v549_v57 = vadd.f32 %v548_v38, %v547_v24  ;;  %v534_v63 = vmul.f32 1.442695, %v532_v26  ;;  %v705_v2 = vrot.slane %v704_v54, 4  ;;  %vm769_vm3 = vcmp.lt.s32.totalorder %v767_v31, %v768_v33 }
  0xdc   : > { %v713_v3 = vadd.f32 %v712_v44, %v711_v14  ;;  %1357 = vrcp.f32 %v520_v41  ;;  %v676_v8 = vadd.f32 %v675_v52, %v674_v18  ;;  %v817_v9 = vsub.f32 %v1658_v50, %v1751_v39 }
  0xdd   : > { %vm496_vm5 = vcmp.lt.s32.totalorder %v494_v29, %v495_v53  ;;  %v734_v10 = vcvt.s32.f32 %v1713_v58  ;;  %v770_v4 = vsel %vm769_vm3, %v767_v31, %v768_v33  ;;  %vm895_vm7 = vcmp.eq.f32.partialorder %v1658_v50, %v1772_v37 }
  0xde   : > { %v1289_v16 = vadd.f32 -1.0, %v559_v12  ;;  %v1291_v40 = vadd.f32 -1.0, %v723_v45  ;;  %vm645_vm12 = vcmp.lt.s32.totalorder %v643_v43, %v644_v48  ;;  %v542_v25 = vadd.f32 %v541_v56, %v540_v51 }
  0xdf   : > { %v550_v5 = vrot.slane %v549_v57, 2  ;;  %1359 = vpow2.f32 %v534_v63  ;;  %v706_v1 = vadd.f32 %v705_v2, %v704_v54  ;;  %v771_v17 = vrot.slane %v770_v4, 1  ;;  %v1350_v23 = vpop.eup %1349 }
  0xe0   : > { %v714_v22 = vrot.slane %v713_v3, 2  ;;  %v497_v24 = vsel %vm496_vm5, %v494_v29, %v495_v53  ;;  %v677_v26 = vrot.slane %v676_v8, 1  ;;  %v820_v18 = vmul.f32 1.442695, %v817_v9  ;;  %v1352_v14 = vpop.eup %1351 }
  0xe1   : > { %v646_v15 = vsel %vm645_vm12, %v643_v43, %v644_v48  ;;  %vm772_vm13 = vcmp.lt.s32.totalorder %v770_v4, %v771_v17  ;;  %v897_v27 = vsel %vm895_vm7, %v1625_v30, 4  ;;  %v967_v19 = vsub.f32 %v1658_v50, %v1772_v37 }
  0xe2   : > { %v563_v0 = vmul.f32 %v1350_v23, %v1289_v16  ;;  %v727_v31 = vmul.f32 %v1352_v14, %v1291_v40  ;;  %v543_v38 = vrot.slane %v542_v25, 2  ;;  %v1822_v51 = vsel %vm772_vm13, %v770_v4, %v771_v17 }
  0xe3   : > { %v551_v35 = vadd.f32 %v550_v5, %v549_v57  ;;  %v707_v29 = vrot.slane %v706_v1, 2  ;;  %vm775_vm14 = vcmp.eq.s32.totalorder %v1621_v20, %v1822_v51  ;;  %v908_v43 = vsel %vm572_vm0, %v897_v27, 2147483647 }
  0xe4   : > { %v647_v44 = vrot.slane %v646_v15, 1  ;;  %v1831_v41 = vsel %vm775_vm14, -1e+30, %v1658_v50  ;;  %1361 = vpow2.f32 %v820_v18  ;;  %v909_v52 = vrot.slane %v908_v43, 4 }
  0xe5   : > { %v1354_v53 = vpop.eup %1353  ;;  %v715_v54 = vadd.f32 %v714_v22, %v713_v3  ;;  %v690_v33 = vsub.f32 %v1779_v47, %v1631_v34  ;;  %v785_v12 = vsel %vm427_vm1, %v1831_v41, -inf  ;;  %v970_v45 = vmul.f32 1.442695, %v967_v19 }
  0xe6   : > { %v1356_v48 = vpop.eup %1355  ;;  %v554_v56 = vsub.s32 %v1689_v28, %v497_v24  ;;  %v544_v57 = vadd.f32 %v543_v38, %v542_v25  ;;  %v786_v63 = vrot.slane %v785_v12, 4  ;;  %vm910_vm15 = vcmp.lt.s32.totalorder %v908_v43, %v909_v52 }
  0xe7   : > { %v565_v2 = vadd.f32 1.0, %v563_v0  ;;  %v729_v9 = vadd.f32 1.0, %v727_v31  ;;  %v708_v4 = vadd.f32 %v707_v29, %v706_v1  ;;  %v911_v16 = vsel %vm910_vm15, %v908_v43, %v909_v52  ;;  %v393_v1 = vpop.trf.xlu1 }
  0xe8   : > { %v552_v40 = vrot.slane %v551_v35, 1  ;;  %vm648_vm4 = vcmp.lt.s32.totalorder %v646_v15, %v647_v44  ;;  %v787_v3 = vmax.f32 %v785_v12, %v786_v63  ;;  %v912_v5 = vrot.slane %v911_v16, 2 }
  0xe9   : > { %v1838_v17 = vpop.eup %1357  ;;  %v716_v34 = vrot.slane %v715_v54, 1  ;;  %v678_v47 = vadd.f32 %v677_v26, %v676_v8  ;;  %v1064_v23 = vadd.f32 0.5, %v734_v10  ;;  %1363 = vpow2.f32 %v970_v45 }
  0xea   : > { %v692_v22 = vmul.f32 1.442695, %v690_v33  ;;  %v545_v18 = vrot.slane %v544_v57, 1  ;;  %v788_v28 = vrot.slane %v787_v3, 2  ;;  %vm913_vm6 = vcmp.lt.s32.totalorder %v911_v16, %v912_v5 }
  0xeb   : > { %v556_v25 = vcvt.s32.f32 %v554_v56  ;;  %v649_v24 = vsel %vm648_vm4, %v646_v15, %v647_v44  ;;  %v709_v14 = vrot.slane %v708_v4, 1  ;;  %v914_v27 = vsel %vm913_vm6, %v911_v16, %v912_v5 }
  0xec   : > { %v1840_v19 = vpop.eup %1359  ;;  %v567_v0 = vmul.f32 %v1354_v53, %v565_v2  ;;  %v731_v31 = vmul.f32 %v1356_v48, %v729_v9  ;;  %v553_v38 = vadd.f32 %v552_v40, %v551_v35  ;;  %v789_v29 = vmax.f32 %v787_v3, %v788_v28 }
  0xed   : > { %v717_v43 = vadd.f32 %v716_v34, %v715_v54  ;;  %1365 = vrcp.f32 %v678_v47  ;;  %v915_v8 = vrot.slane %v914_v27, 1  ;;  %v740_v10 = vmax.f32 %v1758_v60, %v739_v21 }
  0xee   : > { %v718_v26 = vsub.s32 %v1713_v58, %v649_v24  ;;  %v546_v52 = vadd.f32 %v545_v18, %v544_v57  ;;  %v790_v15 = vrot.slane %v789_v29, 1  ;;  %v847_v44 = vsel %vm775_vm14, %v393_v1, 0.0 }
  0xef   : > { %v558_v33 = vand.u32 2147483647, %v556_v25  ;;  %1367 = vpow2.f32 %v692_v22  ;;  %v710_v53 = vadd.f32 %v709_v14, %v708_v4  ;;  %vm916_vm8 = vcmp.lt.s32.totalorder %v914_v27, %v915_v8 }
  0xf0   : > { %v1849_v35 = vadd.f32 %v731_v31, %v567_v0  ;;  %v1045_v54 = vsub.f32 %v1776_v42, %v553_v38  ;;  %v1852_v12 = vmax.f32 %v789_v29, %v790_v15  ;;  %v1854_v45 = vsel %vm916_vm8, %v914_v27, %v915_v8 }
  0xf1   : > { %v1362_v60 = vpop.eup %1361  ;;  %v1067_v58 = vadd.f32 %v1782_v32, %v717_v43  ;;  %vm919_vm9 = vcmp.eq.s32.totalorder %v1621_v20, %v1854_v45  ;;  %v855_v21 = vsel %vm427_vm1, %v847_v44, 0.0  ;;  %v741_v48 = vrot.slane %v740_v10, 1 }
  0xf2   : > { %v720_v56 = vcvt.s32.f32 %v718_v26  ;;  %v1044_v57 = vsub.f32 %v1788_v13, %v546_v52  ;;  %vm793_vm10 = vcmp.eq.f32.partialorder %v1831_v41, %v1852_v12  ;;  %v927_v42 = vsel %vm919_vm9, -1e+30, %v923_v7 }
  0xf3   : > { %v1066_v63 = vadd.f32 %v1064_v23, %v710_v53  ;;  %v795_v32 = vsel %vm793_vm10, %v1621_v20, 4  ;;  %v935_v2 = vsel %vm427_vm1, %v927_v42, -inf  ;;  %v1005_v9 = vrot.slane %v393_v1, 4 }
  0xf4   : > { %v806_v4 = vsel %vm427_vm1, %v795_v32, 2147483647  ;;  %v829_v16 = vsel %vm427_vm1, %v1362_v60, 0.0  ;;  %v936_v13 = vrot.slane %v935_v2, 4  ;;  %v856_v40 = vrot.slane %v855_v21, 4 }
  0xf5   : > { %v1058_v41 = vmul.f32 %v1706_v46, %v1045_v54  ;;  %v1873_v3 = vadd.f32 -1.0, %v558_v33  ;;  %v807_v50 = vrot.slane %v806_v4, 4  ;;  %v1875_v5 = vmax.f32 %v740_v10, %v741_v48 }
  0xf6   : > { %v1364_v7 = vpop.eup %1363  ;;  %v1069_v34 = vmul.f32 %v1067_v58, %v1706_v46  ;;  %v722_v47 = vand.u32 2147483647, %v720_v56  ;;  %v879_v23 = vcvt.s32.f32 %v1822_v51  ;;  %v937_v22 = vmax.f32 %v935_v2, %v936_v13 }
  0xf7   : > { %v1057_v18 = vmul.f32 %v1720_v6, %v1044_v57  ;;  %vm808_vm11 = vcmp.lt.s32.totalorder %v806_v4, %v807_v50  ;;  %v830_v28 = vrot.slane %v829_v16, 4  ;;  %v1009_v25 = vsel %vm919_vm9, %v1005_v9, 0.0 }
  0xf8   : > { %v1068_v24 = vmul.f32 %v1066_v63, %v1720_v6  ;;  %v809_v14 = vsel %vm808_vm11, %v806_v4, %v807_v50  ;;  %v938_v27 = vrot.slane %v937_v22, 2  ;;  %v857_v1 = vadd.f32 %v856_v40, %v855_v21 }
  0xf9   : > { %v810_v0 = vrot.slane %v809_v14, 2  ;;  %v975_v31 = vrot.slane %v1364_v7, 4  ;;  %vm750_vm2 = vcmp.eq.f32.partialorder %v1716_v62, %v1875_v5  ;;  %v883_v46 = vrot.slane %v1760_v61, 2 }
  0xfa   : > { %v1887_v38 = vpop.eup %1365  ;;  %v939_v29 = vmax.f32 %v937_v22, %v938_v27  ;;  %v1017_v43 = vsel %vm427_vm1, %v1009_v25, 0.0  ;;  %v752_v8 = vsel %vm750_vm2, %v1621_v20, 4  ;;  %v816_v6 = vsub.f32 %v1716_v62, %v1875_v5 }
  0xfb   : > { %vm811_vm3 = vcmp.lt.s32.totalorder %v809_v14, %v810_v0  ;;  %v831_v10 = vadd.f32 %v830_v28, %v829_v16  ;;  %v1893_v26 = vadd.f32 0.5, %v879_v23  ;;  %v754_v52 = vsel %vm427_vm1, %v752_v8, 2147483647 }
  0xfc   : > { %v1896_v15 = vpop.eup %1367  ;;  %v1061_v44 = vcombine.low %v1057_v18, %v1058_v41  ;;  %v940_v33 = vrot.slane %v939_v29, 1  ;;  %v858_v53 = vrot.slane %v857_v1, 2  ;;  %v755_v54 = vrot.slane %v754_v52, 4 }
  0xfd   : > { %v1072_v60 = vcombine.low %v1068_v24, %v1069_v34  ;;  %v985_v58 = vsel %vm427_vm1, %v975_v31, 0.0  ;;  %v1018_v21 = vrot.slane %v1017_v43, 4  ;;  %v818_v48 = vmul.f32 1.442695, %v816_v6 }
  0xfe   : > { %v812_v56 = vsel %vm811_vm3, %v809_v14, %v810_v0  ;;  %v1899_v57 = vmax.f32 %v939_v29, %v940_v33  ;;  %vm756_vm5 = vcmp.lt.s32.totalorder %v754_v52, %v755_v54  ;;  %v884_v63 = vmax.f32 %v1760_v61, %v883_v46 }
  0xff   : > { %v1902_v32 = vadd.f32 -1.0, %v722_v47  ;;  %v832_v2 = vrot.slane %v831_v10, 2  ;;  %v1907_v9 = vrot.slane %v1639_v36, %v1085_v11  ;;  %v757_v4 = vsel %vm756_vm5, %v754_v52, %v755_v54 }
 0x100   : > { %vm943_vm7 = vcmp.eq.f32.partialorder %v927_v42, %v1899_v57  ;;  %v986_v16 = vrot.slane %v985_v58, 4  ;;  %v859_v13 = vadd.f32 %v858_v53, %v857_v1  ;;  %1369 = vpow2.f32 %v818_v48 }
 0x101   : > { %v813_v40 = vrot.slane %v812_v56, 1  ;;  %v945_v41 = vsel %vm943_vm7, %v1621_v20, 4  ;;  %v1019_v50 = vadd.f32 %v1018_v21, %v1017_v43  ;;  %v758_v7 = vrot.slane %v757_v4, 2  ;;  %v361_v21 = vpop.trf.xlu0 }
 0x102   : > { %v1912_v61 = vadd.f32 %v1061_v44, %v1708_v49  ;;  %v1915_v34 = vsub.f32 %v1711_v55, %v1072_v60  ;;  %v956_v11 = vsel %vm427_vm1, %v945_v41, 2147483647  ;;  %v885_v47 = vrot.slane %v884_v63, 1 }
 0x103   : > { %v833_v23 = vadd.f32 %v832_v2, %v831_v10  ;;  %v841_v42 = vsub.f32 %v1852_v12, %v1751_v39  ;;  %v957_v22 = vrot.slane %v956_v11, 4  ;;  %vm759_vm12 = vcmp.lt.s32.totalorder %v757_v4, %v758_v7 }
 0x104   : > { %v1041_v18 = vcvt.s32.f32 %v1854_v45  ;;  %v860_v28 = vrot.slane %v859_v13, 1  ;;  %v760_v25 = vsel %vm759_vm12, %v757_v4, %v758_v7  ;;  %v1921_v24 = vmax.f32 %v884_v63, %v885_v47 }
 0x105   : > { %vm1923_vm13 = vcmp.lt.s32.totalorder %v812_v56, %v813_v40  ;;  %vm958_vm14 = vcmp.lt.s32.totalorder %v956_v11, %v957_v22  ;;  %v987_v27 = vadd.f32 %v986_v16, %v985_v58  ;;  %v1020_v1 = vrot.slane %v1019_v50, 2 }
 0x106   : > { %v959_v0 = vsel %vm958_vm14, %v956_v11, %v957_v22  ;;  %v761_v31 = vrot.slane %v760_v25, 1  ;;  %vm894_vm15 = vcmp.eq.f32.partialorder %v1716_v62, %v1921_v24  ;;  %v966_v39 = vsub.f32 %v1716_v62, %v1921_v24 }
 0x107   : > { %v834_v12 = vrot.slane %v833_v23, 1  ;;  %v844_v46 = vmul.f32 1.442695, %v841_v42  ;;  %v960_v29 = vrot.slane %v959_v0, 2  ;;  %v896_v43 = vsel %vm894_vm15, %v1625_v30, 4 }
 0x108   : > { %v861_v8 = vadd.f32 %v860_v28, %v859_v13  ;;  %vm762_vm4 = vcmp.lt.s32.totalorder %v760_v25, %v761_v31  ;;  %v898_v6 = vsel %vm572_vm0, %v896_v43, 2147483647  ;;  %v968_v10 = vmul.f32 1.442695, %v966_v39 }
 0x109   : > { %v815_v52 = vsel %vm1923_vm13, %v812_v56, %v813_v40  ;;  %vm961_vm6 = vcmp.lt.s32.totalorder %v959_v0, %v960_v29  ;;  %v1935_v44 = vsel %vm762_vm4, %v760_v25, %v761_v31  ;;  %v899_v33 = vrot.slane %v898_v6, 4 }
 0x10a   : > { %v988_v53 = vrot.slane %v987_v27, 2  ;;  %v1021_v54 = vadd.f32 %v1020_v1, %v1019_v50  ;;  %vm774_vm8 = vcmp.eq.s32.totalorder %v1621_v20, %v1935_v44  ;;  %1371 = vpow2.f32 %v968_v10 }
 0x10b   : > { %v1109_v30 = vmax.f32 %v1912_v61, 0.0  ;;  %v1940_v60 = vadd.f32 0.5, %v1041_v18  ;;  %v1946_v58 = vsel %vm774_vm8, -1e+30, %v1716_v62  ;;  %vm900_vm0 = vcmp.lt.s32.totalorder %v898_v6, %v899_v33 }
 0x10c   : > { %v863_v48 = vsub.s32 %v1822_v51, %v815_v52  ;;  %v962_v56 = vsel %vm961_vm6, %v959_v0, %v960_v29  ;;  %v778_v63 = vsel %vm427_vm1, %v1946_v58, -inf  ;;  %v901_v2 = vsel %vm900_vm0, %v898_v6, %v899_v33 }
 0x10d   : > { %v1370_v4 = vpop.eup %1369  ;;  %v835_v16 = vadd.f32 %v834_v12, %v833_v23  ;;  %1373 = vpow2.f32 %v844_v46  ;;  %v1078_v13 = vsub.f32 %v1893_v26, %v861_v8  ;;  %v779_v40 = vrot.slane %v778_v63, 4 }
 0x10e   : > { %v989_v41 = vadd.f32 %v988_v53, %v987_v27  ;;  %v1022_v50 = vrot.slane %v1021_v54, 1  ;;  %v902_v7 = vrot.slane %v901_v2, 2  ;;  %v846_v11 = vsel %vm774_vm8, %v361_v21, 0.0 }
 0x10f   : > { %v963_v47 = vrot.slane %v962_v56, 1  ;;  %v997_v51 = vsub.f32 %v1899_v57, %v1772_v37  ;;  %v780_v42 = vmax.f32 %v778_v63, %v779_v40  ;;  %v848_v22 = vsel %vm427_vm1, %v846_v11, 0.0 }
 0x110   : > { %v865_v18 = vcvt.s32.f32 %v863_v48  ;;  %v822_v23 = vsel %vm427_vm1, %v1370_v4, 0.0  ;;  %vm903_vm9 = vcmp.lt.s32.totalorder %v901_v2, %v902_v7  ;;  %v849_v26 = vrot.slane %v848_v22, 4 }
 0x111   : > { %1375 = vrcp.f32 %v835_v16  ;;  %v1960_v28 = vmul.f32 %v1907_v9, %v1078_v13  ;;  %v781_v25 = vrot.slane %v780_v42, 2  ;;  %v904_v14 = vsel %vm903_vm9, %v901_v2, %v902_v7 }
 0x112   : > { %v990_v27 = vrot.slane %v989_v41, 1  ;;  %v1023_v1 = vadd.f32 %v1022_v50, %v1021_v54  ;;  %v905_v0 = vrot.slane %v904_v14, 1  ;;  %v850_v31 = vadd.f32 %v849_v26, %v848_v22 }
 0x113   : > { %vm964_vm10 = vcmp.lt.s32.totalorder %v962_v56, %v963_v47  ;;  %v1000_v37 = vmul.f32 1.442695, %v997_v51  ;;  %v782_v57 = vmax.f32 %v780_v42, %v781_v25  ;;  %v823_v39 = vrot.slane %v822_v23, 4 }
 0x114   : > { %v867_v12 = vand.u32 2147483647, %v865_v18  ;;  %v878_v46 = vcvt.s32.f32 %v1935_v44  ;;  %vm906_vm11 = vcmp.lt.s32.totalorder %v904_v14, %v905_v0  ;;  %v851_v29 = vrot.slane %v850_v31, 2 }
 0x115   : > { %v783_v43 = vrot.slane %v782_v57, 1  ;;  %v1963_v8 = vsel %vm906_vm11, %v904_v14, %v905_v0  ;;  %v922_v6 = vrot.slane %v1716_v62, 4  ;;  %v1004_v10 = vrot.slane %v361_v21, 4 }
 0x116   : > { %v965_v52 = vsel %vm964_vm10, %v962_v56, %v963_v47  ;;  %vm918_vm2 = vcmp.eq.s32.totalorder %v1621_v20, %v1963_v8  ;;  %v1081_v33 = vsub.s32 3, %v1621_v20  ;;  %v852_v53 = vadd.f32 %v851_v29, %v850_v31 }
 0x117   : > { %v1372_v54 = vpop.eup %1371  ;;  %1377 = vpow2.f32 %v1000_v37  ;;  %v784_v48 = vmax.f32 %v782_v57, %v783_v43  ;;  %v824_v63 = vadd.f32 %v823_v39, %v822_v23  ;;  %v926_v2 = vsel %vm918_vm2, -1e+30, %v922_v6 }
 0x118   : > { %v1293_v4 = vadd.f32 -1.0, %v867_v12  ;;  %v928_v16 = vsel %vm427_vm1, %v926_v2, -inf  ;;  %v974_v13 = vrot.slane %v1372_v54, 4  ;;  %v1075_v40 = vadd.f32 0.5, %v878_v46 }
 0x119   : > { %v1025_v62 = vsub.s32 %v1854_v45, %v965_v52  ;;  %vm792_vm3 = vcmp.eq.f32.partialorder %v1946_v58, %v784_v48  ;;  %v929_v21 = vrot.slane %v928_v16, 4  ;;  %v1008_v56 = vsel %vm918_vm2, %v1004_v10, 0.0 }
 0x11a   : > { %v1374_v50 = vpop.eup %1373  ;;  %v794_v7 = vsel %vm792_vm3, %v1621_v20, 4  ;;  %v978_v11 = vsel %vm427_vm1, %v974_v13, 0.0  ;;  %v1975_v47 = vrot.slane %v1639_v36, %v1081_v33  ;;  %v853_v51 = vrot.slane %v852_v53, 1 }
 0x11b   : > { %v796_v42 = vsel %vm427_vm1, %v794_v7, 2147483647  ;;  %v825_v22 = vrot.slane %v824_v63, 2  ;;  %v840_v18 = vsub.f32 %v784_v48, %v1875_v5  ;;  %v930_v23 = vmax.f32 %v928_v16, %v929_v21 }
 0x11c   : > { %v797_v45 = vrot.slane %v796_v42, 4  ;;  %v979_v26 = vrot.slane %v978_v11, 4  ;;  %v854_v58 = vadd.f32 %v853_v51, %v852_v53  ;;  %v1010_v25 = vsel %vm427_vm1, %v1008_v56, 0.0 }
 0x11d   : > { %v991_v14 = vadd.f32 %v990_v27, %v989_v41  ;;  %v1027_v0 = vcvt.s32.f32 %v1025_v62  ;;  %v931_v31 = vrot.slane %v930_v23, 2  ;;  %v1011_v37 = vrot.slane %v1010_v25, 4 }
 0x11e   : > { %v1376_v57 = vpop.eup %1375  ;;  %v871_v39 = vmul.f32 %v1374_v50, %v1293_v4  ;;  %vm798_vm5 = vcmp.lt.s32.totalorder %v796_v42, %v797_v45  ;;  %v980_v36 = vadd.f32 %v979_v26, %v978_v11  ;;  %v1077_v12 = vsub.f32 %v1075_v40, %v854_v58 }
 0x11f   : > { %v1100_v46 = vadd.f32 %v1940_v60, %v1023_v1  ;;  %v799_v29 = vsel %vm798_vm5, %v796_v42, %v797_v45  ;;  %v932_v43 = vmax.f32 %v930_v23, %v931_v31  ;;  %v1012_v5 = vadd.f32 %v1011_v37, %v1010_v25 }
 0x120   : > { %v800_v6 = vrot.slane %v799_v29, 2  ;;  %v826_v10 = vadd.f32 %v825_v22, %v824_v63  ;;  %v842_v52 = vmul.f32 1.442695, %v840_v18  ;;  %v1089_v33 = vmul.f32 %v1975_v47, %v1077_v12 }
 0x121   : > { %v1029_v53 = vand.u32 2147483647, %v1027_v0  ;;  %v933_v41 = vrot.slane %v932_v43, 1  ;;  %v981_v27 = vrot.slane %v980_v36, 2  ;;  %v1013_v54 = vrot.slane %v1012_v5, 2 }
 0x122   : > { %v873_v48 = vadd.f32 1.0, %v871_v39  ;;  %1379 = vrcp.f32 %v991_v14  ;;  %vm801_vm7 = vcmp.lt.s32.totalorder %v799_v29, %v800_v6  ;;  %v1093_v4 = vcombine.low %v1089_v33, %v1960_v28 }
 0x123   : > { %v802_v16 = vsel %vm801_vm7, %v799_v29, %v800_v6  ;;  %v934_v13 = vmax.f32 %v932_v43, %v933_v41  ;;  %v1040_v60 = vcvt.s32.f32 %v1963_v8  ;;  %v1014_v1 = vadd.f32 %v1013_v54, %v1012_v5 }
 0x124   : > { %v1378_v40 = vpop.eup %1377  ;;  %v803_v62 = vrot.slane %v802_v16, 1  ;;  %v827_v63 = vrot.slane %v826_v10, 1  ;;  %1381 = vpow2.f32 %v842_v52  ;;  %v1094_v21 = vrot.slane %v1093_v4, 7 }
 0x125   : > { %v1295_v56 = vadd.f32 -1.0, %v1029_v53  ;;  %vm942_vm12 = vcmp.eq.f32.partialorder %v926_v2, %v934_v13  ;;  %v982_v50 = vadd.f32 %v981_v27, %v980_v36  ;;  %v1015_v7 = vrot.slane %v1014_v1, 1 }
 0x126   : > { %vm804_vm13 = vcmp.lt.s32.totalorder %v802_v16, %v803_v62  ;;  %v944_v11 = vsel %vm942_vm12, %v1621_v20, 4  ;;  %v996_v51 = vsub.f32 %v934_v13, %v1921_v24  ;;  %v1096_v28 = vadd.f32 %v1094_v21, %v1708_v49 }
 0x127   : > { %v805_v42 = vsel %vm804_vm13, %v802_v16, %v803_v62  ;;  %v946_v22 = vsel %vm427_vm1, %v944_v11, 2147483647  ;;  %v1097_v18 = vadd.f32 0.5, %v1040_v60  ;;  %v1016_v23 = vadd.f32 %v1015_v7, %v1014_v1 }
 0x128   : > { %v828_v45 = vadd.f32 %v827_v63, %v826_v10  ;;  %v862_v26 = vsub.s32 %v1935_v44, %v805_v42  ;;  %v947_v58 = vrot.slane %v946_v22, 4  ;;  %v1113_v25 = vmax.f32 %v1096_v28, 0.0 }
 0x129   : > { %v1111_v2 = vmax.f32 %v1915_v34, 0.0  ;;  %v1033_v14 = vmul.f32 %v1378_v40, %v1295_v56  ;;  %v1102_v0 = vmul.f32 %v1100_v46, %v1907_v9  ;;  %v1099_v31 = vadd.f32 %v1097_v18, %v1016_v23 }
 0x12a   : > { %v864_v37 = vcvt.s32.f32 %v862_v26  ;;  %vm948_vm14 = vcmp.lt.s32.totalorder %v946_v22, %v947_v58  ;;  %v983_v24 = vrot.slane %v982_v50, 1  ;;  %v998_v49 = vmul.f32 1.442695, %v996_v51 }
 0x12b   : > { %v949_v39 = vsel %vm948_vm14, %v946_v22, %v947_v58  ;;  %v1101_v36 = vmul.f32 %v1099_v31, %v1975_v47  ;;  %v1114_v12 = vmin.f32 %v1113_v25, 63.0  ;;  %v1137_v29 = vsub.s32 5, %v1621_v20 }
 0x12c   : > { %v875_v43 = vmul.f32 %v1376_v57, %v873_v48  ;;  %1383 = vrcp.f32 %v828_v45  ;;  %v866_v44 = vand.u32 2147483647, %v864_v37  ;;  %v950_v5 = vrot.slane %v949_v39, 2 }
 0x12d   : > { %v562_v34 = vmul.f32 %v1840_v19, %v1873_v3  ;;  %v1110_v9 = vmin.f32 %v1109_v30, 79.0  ;;  %v1035_v46 = vadd.f32 1.0, %v1033_v14  ;;  %v1105_v6 = vcombine.low %v1101_v36, %v1102_v0 }
 0x12e   : > { %v1292_v10 = vadd.f32 -1.0, %v866_v44  ;;  %vm951_vm15 = vcmp.lt.s32.totalorder %v949_v39, %v950_v5  ;;  %v984_v52 = vadd.f32 %v983_v24, %v982_v50  ;;  %1385 = vpow2.f32 %v998_v49 }
 0x12f   : > { %v1380_v47 = vpop.eup %1379  ;;  %v726_v33 = vmul.f32 %v1896_v15, %v1902_v32  ;;  %v952_v57 = vsel %vm951_vm15, %v949_v39, %v950_v5  ;;  %v1106_v53 = vrot.slane %v1105_v6, 7  ;;  %v1138_v41 = vrot.slane %v1114_v12, %v1137_v29 }
 0x130   : > { %v877_v27 = vadd.f32 %v875_v43, %v1849_v35  ;;  %v953_v19 = vrot.slane %v952_v57, 1  ;;  %v1112_v3 = vmin.f32 %v1111_v2, 79.0  ;;  %vm1163_vm4 = vcmask 1040384  }
 0x131   : > { %v1382_v61 = vpop.eup %1381  ;;  %v564_v30 = vadd.f32 1.0, %v562_v34  ;;  %v1127_v54 = vrot.slane %v1110_v9, %v1126_v59  ;;  %v1108_v48 = vsub.f32 %v1711_v55, %v1106_v53  ;;  %v1037_v4 = vmul.f32 %v1380_v47, %v1035_v46 }
 0x132   : > { %v870_v16 = vmul.f32 %v1382_v61, %v1292_v10  ;;  %vm954_vm6 = vcmp.lt.s32.totalorder %v952_v57, %v953_v19  ;;  %1387 = vrcp.f32 %v984_v52  ;;  %vm1166_vm8 = vcmask 1041408  }
 0x133   : > { %v955_v15 = vsel %vm954_vm6, %v952_v57, %v953_v19  ;;  %v1115_v32 = vmax.f32 %v1108_v48, 0.0  ;;  %v1165_v35 = vsel %vm1163_vm4, %v1127_v54, %v1138_v41  ;;  %v728_v13 = vadd.f32 1.0, %v726_v33 }
 0x134   : > { %v1024_v60 = vsub.s32 %v1963_v8, %v955_v15  ;;  %v1039_v1 = vadd.f32 %v1037_v4, %v877_v27  ;;  %v1149_v40 = vrot.slane %v1112_v3, %v1126_v59  ;;  %v1133_v55 = vsub.s32 1, %v1621_v20 }
 0x135   : > { %v1116_v62 = vmin.f32 %v1115_v32, 63.0  ;;  %v872_v63 = vadd.f32 1.0, %v870_v16  ;;  %vm1169_vm0 = vcmask 1042432   ;;  %v566_v50 = vmul.f32 %v1838_v17, %v564_v30 }
 0x136   : > { %v1026_v21 = vcvt.s32.f32 %v1024_v60  ;;  %v1168_v56 = vsel %vm1166_vm8, %v1165_v35, %v1149_v40  ;;  %v1122_v7 = vsub.s32 0, %v1621_v20  ;;  %v730_v8 = vmul.f32 %v1887_v38, %v728_v13 }
 0x137   : > { %v1160_v11 = vrot.slane %v1116_v62, %v1137_v29  ;;  %v1118_v28 = vmul.f32 0.25, %v1039_v1  ;;  %vm1174_vm9 = vcmask 1044480   ;;  %v1134_v42 = vrot.slane %v1114_v12, %v1133_v55 }
 0x138   : > { %v1028_v51 = vand.u32 2147483647, %v1026_v21  ;;  %v1123_v58 = vrot.slane %v1110_v9, %v1122_v7  ;;  %v732_v20 = vadd.f32 %v730_v8, %v566_v50  ;;  %v1145_v0 = vrot.slane %v1112_v3, %v1122_v7 }
 0x139   : > { %v1384_v59 = vpop.eup %1383  ;;  %v1171_v22 = vsel %vm1169_vm0, %v1168_v56, %v1160_v11  ;;  %v1156_v37 = vrot.slane %v1116_v62, %v1133_v55 }
 0x13a   : > { %v874_v18 = vmul.f32 %v1384_v59, %v872_v63  ;;  %v1294_v23 = vadd.f32 -1.0, %v1028_v51  ;;  %v1173_v45 = vsel %vm427_vm1, %v1171_v22, %v1118_v28  ;;  %v1164_v38 = vsel %vm1163_vm4, %v1123_v58, %v1134_v42 }
 0x13b   : > { %v1386_v26 = vpop.eup %1385  ;;  %v1176_v17 = vsel %vm1174_vm9, %v1173_v45, 0.0  ;;  %v1167_v49 = vsel %vm1166_vm8, %v1164_v38, %v1145_v0 }
 0x13c   : > { %v1032_v25 = vmul.f32 %v1386_v26, %v1294_v23  ;;  %1178 = vst [vmem:[%s196_s17 + $0x8] sm:$0xff] %v1176_v17  ;;  %v876_v2 = vadd.f32 %v874_v18, %v732_v20  ;;  %v1170_v36 = vsel %vm1169_vm0, %v1167_v49, %v1156_v37 }
 0x13e   : > { %v1034_v14 = vadd.f32 1.0, %v1032_v25 }
 0x13f   : > { %v1388_v31 = vpop.eup %1387 }
 0x140   : > { %v1036_v24 = vmul.f32 %v1388_v31, %v1034_v14 }
 0x142   : > { %v1038_v39 = vadd.f32 %v1036_v24, %v876_v2 }
 0x144   : > { %v1117_v12 = vmul.f32 0.25, %v1038_v39 }
 0x146   : > { %v1172_v29 = vsel %vm427_vm1, %v1170_v36, %v1117_v12 }
 0x147   : > { %v1175_v43 = vsel %vm1174_vm9, %v1172_v29, 0.0 }
 0x148   : > { %1177 = vst [vmem:[%s196_s17] sm:$0xff] %v1175_v43 }
 0x149   : > { %1402 = shalt.err (!%p1399_p4)
}
 0x14a   : > { %s1403_s4 = scalar_lea.hbm %s2026_s26, 256  ;;  %s1407_s7 = scalar_lea.hbm %s2067_s3, 512 }
 0x14b   : > { %p1404_p7 = scmp.ne.s32.totalorder %s2026_s26, %s1403_s4  ;;  %p1408_p10 = scmp.lt.s32.totalorder %s2026_s26, %s2067_s3 }
 0x14c   : > { %p1409_p11 = scmp.lt.s32.totalorder %s1407_s7, %s1403_s4 }
 0x14d   : > { %p1405_p8 = pnand %p1404_p7, %p1510_p5 }
 0x14e   : > { %p1410_p12 = por %p1409_p11, %p1408_p10 }
 0x14f   : > { %p1406_p9 = pneg %p1405_p8 }
 0x151   : > { %p1411_p13 = pnand %p1410_p12, %p1406_p9 }
 0x153   : > { %1414 = shalt.err (!%p1411_p13)
}
 0x154   : > { %1302 = dma.vmem_to_hbm [thread:$0]  (%p1510_p5), %s1195_s20, 256, %s2026_s26, %s1180_s27  }
 0x155 PF: > { %p1308_p0 = scmp.ge.s32.totalorder %s1449_s15, 2  ;;  %s1206_s10 = sand.u32 1, %s1437_s12  }
 0x156   : > { %s1207_s11 = scalar_lea.sflag [#allocation3], %s1206_s10 }
 0x157   : > { %p1305_p1 = pnand %p1308_p0, %p1514_p6 }
 0x159   : > { %p1306_p2 = pneg %p1305_p1 }
 0x15b   : > { %1432 = dma.done.wait (%p1306_p2), %s1207_s11, 256  }
 0x15c   : > { %1434 = vsyncadd (%p1306_p2), %s1207_s11, 4294967040  ;;  %p13_p3 = scmp.ge.s32.totalorder %s1497_s18, 4   ;;  %s2072_s12 = smov %s1441_s13 }
 0x15d   : > { %s2073_s13 = smov %s1445_s14  ;;  %s2074_s14 = smov %s1508_s21 }
 0x15e   : > { %s2075_s15 = smov %s1497_s18  ;;  %15 = sbr.rel (!%p13_p3) target bundleno = 3 (0x3), region = 73 }
 0x163   :  { %1212 = vsyncpa [#allocation3], 1 }
 0x164   :  { %1214 = vsyncpa [#allocation3 + $0x1], 1 }

</bundles_post_ra>
